<compile_context>
chip_gen: v7x
topology: tpu7x:2x2x1
jax: 0.10.0
libtpu: 0.0.40
codegen_flags: <defaults>
</compile_context>

<pallas_src>
import math
from functools import partial

import jax
import jax.numpy as jnp
from jax import lax
from jax.experimental import pallas as pl
from jax.experimental.pallas import tpu as pltpu

_INV_SQRT2 = 1.0 / math.sqrt(2.0)


def _erf(z):
    # Abramowitz & Stegun 7.1.26 polynomial (|abs err| < ~1.5e-7), exp on EUP.
    # Exact divide here (NOT approx reciprocal) to preserve the error bound.
    p = 0.3275911
    a1, a2, a3, a4, a5 = 0.254829592, -0.284496736, 1.421413741, -1.453152027, 1.061405429
    az = jnp.abs(z)
    t = 1.0 / (1.0 + p * az)
    poly = ((((a5 * t + a4) * t + a3) * t + a2) * t + a1) * t
    y = 1.0 - poly * jnp.exp(-az * az)
    return jnp.where(z >= 0.0, y, -y)


def _gelu(v):
    # exact (erf-based) GELU, matching torch.nn.GELU() default
    return 0.5 * v * (1.0 + _erf(v * _INV_SQRT2))


def _mxu(a, b):
    # MXU matmul: bf16 operands, f32 accumulation.
    return jnp.dot(a.astype(jnp.bfloat16), b.astype(jnp.bfloat16),
                   preferred_element_type=jnp.float32)


def _mxu_nt(a, b):
    # a @ b.T without materializing the transpose (contract last dims of both).
    return lax.dot_general(a.astype(jnp.bfloat16), b.astype(jnp.bfloat16),
                           (((1,), (1,)), ((), ())),
                           preferred_element_type=jnp.float32)


def encoder_kernel(x_ref, gamma_ref, beta_ref,
                   wq_ref, bq_ref, wk_ref, bk_ref, wv_ref, bv_ref,
                   wo_ref, bo_ref, w1_ref, b1_ref, w2_ref, b2_ref,
                   o_ref, *, num_heads):
    # One grid step == one batch element: x_ref is the (S, E) slab for batch b.
    x = x_ref[...].astype(jnp.float32)            # (S, E)
    gamma = gamma_ref[...]                        # (1, E) f32, shared by both norms
    beta = beta_ref[...]

    def layernorm(v):                             # strictly f32 (v5e-safe)
        mu = jnp.mean(v, axis=-1, keepdims=True)
        var = jnp.mean((v - mu) ** 2, axis=-1, keepdims=True)
        return (v - mu) * lax.rsqrt(var + 1e-5) * gamma + beta

    # ---- multi-head self-attention on LayerNorm(x), per-batch (no mask) ----
    xn = layernorm(x)
    attn = jnp.broadcast_to(bo_ref[...], x.shape)          # start from out-proj bias

    # TODO(synk): lax.fori_loop / grid axis over heads at real head counts.
    for h in range(num_heads):                             # static, unrolled (H small)
        # head-major weight slabs: leading-axis index -> clean (E, Dh)/(Dh, E) views,
        # no sub-128 lane slicing anywhere.
        q = _mxu(xn, wq_ref[h]) + bq_ref[h]                # (S, Dh); 1/sqrt(Dh) folded
        k = _mxu(xn, wk_ref[h]) + bk_ref[h]
        v = _mxu(xn, wv_ref[h]) + bv_ref[h]
        s = _mxu_nt(q, k)                                  # (S, S) per-batch scores
        s = s - jnp.max(s, axis=-1, keepdims=True)
        p = jnp.exp(s)
        p = p * pl.reciprocal(jnp.sum(p, axis=-1, keepdims=True), approx=True)
        ctx = _mxu(p, v)                                   # (S, Dh)
        attn = attn + _mxu(ctx, wo_ref[h])                 # accumulate out-projection

    # ---- residual + (shared) LayerNorm + MLP (Linear-GELU-Linear-GELU) ----
    yn = layernorm(attn + x)
    h1 = _gelu(_mxu(yn, w1_ref[...]) + b1_ref[...])
    h2 = _gelu(_mxu(h1, w2_ref[...]) + b2_ref[...])

    o_ref[...] = (h2 + attn + x).astype(o_ref.dtype)       # lane-dense store at E%128==0


_PARAM_ORDER = ("gamma", "beta", "wq", "bq", "wk", "bk", "wv", "bv",
                "wo", "bo", "w1", "b1", "w2", "b2")


def encoder_forward(x_sbe, params, num_heads):
    """x_sbe: (S, B, E) -- nn.MultiheadAttention default (seq, batch, embed)."""
    S, B, E = x_sbe.shape
    assert E % num_heads == 0

    # Batch-major layout for the per-batch grid; a single cheap XLA transpose
    # outside the kernel (callers holding batch-first data skip it entirely).
    x_bse = jnp.transpose(x_sbe, (1, 0, 2))

    weights = tuple(params[n] for n in _PARAM_ORDER)

    def full_spec(a):
        # grid-invariant operand: full block, constant index map (resident in VMEM)
        nd = a.ndim
        return pl.BlockSpec(a.shape, lambda b, _nd=nd: (0,) * _nd)

    out_bse = pl.pallas_call(
        partial(encoder_kernel, num_heads=num_heads),
        out_shape=jax.ShapeDtypeStruct((B, S, E), x_sbe.dtype),
        grid=(B,),
        in_specs=[pl.BlockSpec((None, S, E), lambda b: (b, 0, 0))]
                 + [full_spec(w) for w in weights],
        out_specs=pl.BlockSpec((None, S, E), lambda b: (b, 0, 0)),
        # batch axis is embarrassingly parallel -> both TensorCores on v7x
        compiler_params=pltpu.CompilerParams(dimension_semantics=("parallel",)),
        # per-step working set is tiny here; set vmem_limit_bytes when tiling
        # real shapes (64 MiB physical on v7x, 128 MiB on v5e/v6e).
    )(x_bse, *weights)

    return jnp.transpose(out_bse, (1, 0, 2))


def init_params(key, E, num_heads):
    """Kernel-layout parameters equivalent to the PyTorch module's tensors.
    Matmul weights are stored bf16 ONCE; 1/sqrt(head_dim) is folded into wq/bq."""
    H = num_heads
    Dh = E // H
    ks = jax.random.split(key, 8)
    s = 0.02
    f32, bf = jnp.float32, jnp.bfloat16

    in_proj_w = s * jax.random.normal(ks[0], (3 * E, E), f32)   # nn.MHA in_proj_weight
    in_proj_b = s * jax.random.normal(ks[1], (3 * E,), f32)
    out_proj_w = s * jax.random.normal(ks[2], (E, E), f32)
    out_proj_b = s * jax.random.normal(ks[3], (E,), f32)
    w1 = s * jax.random.normal(ks[4], (E, E), f32)
    b1 = s * jax.random.normal(ks[5], (E,), f32)
    w2 = s * jax.random.normal(ks[6], (E, E), f32)
    b2 = s * jax.random.normal(ks[7], (E,), f32)

    scale = 1.0 / math.sqrt(Dh)

    def head_major(w_torch):           # (E_out=E, E_in=E) -> (H, E_in, Dh)
        return w_torch.T.reshape(E, H, Dh).transpose(1, 0, 2)

    wq = head_major(in_proj_w[0:E]) * scale
    wk = head_major(in_proj_w[E:2 * E])
    wv = head_major(in_proj_w[2 * E:3 * E])
    bq = in_proj_b[0:E].reshape(H, 1, Dh) * scale
    bk = in_proj_b[E:2 * E].reshape(H, 1, Dh)
    bv = in_proj_b[2 * E:3 * E].reshape(H, 1, Dh)
    wo = out_proj_w.T.reshape(H, Dh, E)

    return dict(
        gamma=jnp.ones((1, E), f32),        # shared nn.LayerNorm affine (default init)
        beta=jnp.zeros((1, E), f32),
        wq=wq.astype(bf), bq=bq, wk=wk.astype(bf), bk=bk, wv=wv.astype(bf), bv=bv,
        wo=wo.astype(bf), bo=out_proj_b.reshape(1, E),
        w1=w1.T.astype(bf), b1=b1.reshape(1, E),
        w2=w2.T.astype(bf), b2=b2.reshape(1, E),
    )


def reference_forward(x_sbe, params, num_heads):
    """Pure-JAX f32 reference with identical semantics (for tolerance check)."""
    S, B, E = x_sbe.shape
    H = num_heads
    f32 = jnp.float32
    g = params["gamma"].astype(f32)
    bt = params["beta"].astype(f32)

    def ln(v):
        mu = jnp.mean(v, -1, keepdims=True)
        var = jnp.mean((v - mu) ** 2, -1, keepdims=True)
        return (v - mu) / jnp.sqrt(var + 1e-5) * g + bt

    xb = jnp.transpose(x_sbe.astype(f32), (1, 0, 2))        # (B, S, E)
    xn = ln(xb)
    wq, wk, wv = (params[n].astype(f32) for n in ("wq", "wk", "wv"))
    q = jnp.einsum('bse,hed->bhsd', xn, wq) + params["bq"].astype(f32).reshape(1, H, 1, -1)
    k = jnp.einsum('bse,hed->bhsd', xn, wk) + params["bk"].astype(f32).reshape(1, H, 1, -1)
    v = jnp.einsum('bse,hed->bhsd', xn, wv) + params["bv"].astype(f32).reshape(1, H, 1, -1)
    s = jnp.einsum('bhqd,bhkd->bhqk', q, k)                  # scale already folded into wq/bq
    p = jax.nn.softmax(s, axis=-1)
    ctx = jnp.einsum('bhqk,bhkd->bhqd', p, v)
    attn = jnp.einsum('bhqd,hde->bqe', ctx, params["wo"].astype(f32)) + params["bo"].astype(f32)
    yn = ln(attn + xb)
    h1 = jax.nn.gelu(yn @ params["w1"].astype(f32) + params["b1"].astype(f32), approximate=False)
    h2 = jax.nn.gelu(h1 @ params["w2"].astype(f32) + params["b2"].astype(f32), approximate=False)
    return jnp.transpose(h2 + attn + xb, (1, 0, 2))


if __name__ == "__main__":
    # Small demo shapes: seq=8, batch=2, embed (mlp_dim) = 128, heads = 4.
    # E=128 keeps every stored last dim lane-dense (multiple of 128) per the
    # review; the kernel is shape-generic and also runs at E=32.
    S, B, E, H = 8, 2, 128, 4
    key = jax.random.PRNGKey(0)
    kx, kp = jax.random.split(key)
    x = jax.random.normal(kx, (S, B, E), jnp.float32)        # (seq, batch, embed)
    params = init_params(kp, E, H)

    fwd = jax.jit(encoder_forward, static_argnames=("num_heads",))
    out = jax.block_until_ready(fwd(x, params, num_heads=H))

    assert out.shape == (S, B, E) and out.dtype == jnp.float32
    assert bool(jnp.all(jnp.isfinite(out)))

    ref = jax.block_until_ready(reference_forward(x, params, H))
    max_err = float(jnp.max(jnp.abs(out - ref)))
    assert max_err < 5e-2, f"max abs err vs f32 reference: {max_err}"
    print("KERNEL_OK")
</pallas_src>

<mosaic_0001>
module attributes {stable_mosaic.version = 11 : i64} {
  func.func @encoder_kernel(%arg0: i32, %arg1: memref<1x8x128xf32, #tpu.memory_space<vmem>>, %arg2: memref<1x128xf32, #tpu.memory_space<vmem>>, %arg3: memref<1x128xf32, #tpu.memory_space<vmem>>, %arg4: memref<4x128x32xbf16, #tpu.memory_space<vmem>>, %arg5: memref<4x1x32xf32, #tpu.memory_space<vmem>>, %arg6: memref<4x128x32xbf16, #tpu.memory_space<vmem>>, %arg7: memref<4x1x32xf32, #tpu.memory_space<vmem>>, %arg8: memref<4x128x32xbf16, #tpu.memory_space<vmem>>, %arg9: memref<4x1x32xf32, #tpu.memory_space<vmem>>, %arg10: memref<4x32x128xbf16, #tpu.memory_space<vmem>>, %arg11: memref<1x128xf32, #tpu.memory_space<vmem>>, %arg12: memref<128x128xbf16, #tpu.memory_space<vmem>>, %arg13: memref<1x128xf32, #tpu.memory_space<vmem>>, %arg14: memref<128x128xbf16, #tpu.memory_space<vmem>>, %arg15: memref<1x128xf32, #tpu.memory_space<vmem>>, %arg16: memref<1x8x128xf32, #tpu.memory_space<vmem>>) attributes {dimension_semantics = [#tpu.dimension_semantics<parallel>], iteration_bounds = array<i64: 2>, scalar_prefetch = 0 : i64, scratch_operands = 0 : i64, tpu.core_type = #tpu.core_type<tc>, window_params = [{transform_indices = @transform_0, window_bounds = array<i64: 1, 8, 128>}, {pipeline_mode = #tpu.pipeline_mode<synchronous>, transform_indices = @transform_1, window_bounds = array<i64: 1, 128>}, {pipeline_mode = #tpu.pipeline_mode<synchronous>, transform_indices = @transform_2, window_bounds = array<i64: 1, 128>}, {pipeline_mode = #tpu.pipeline_mode<synchronous>, transform_indices = @transform_3, window_bounds = array<i64: 4, 128, 32>}, {pipeline_mode = #tpu.pipeline_mode<synchronous>, transform_indices = @transform_4, window_bounds = array<i64: 4, 1, 32>}, {pipeline_mode = #tpu.pipeline_mode<synchronous>, transform_indices = @transform_5, window_bounds = array<i64: 4, 128, 32>}, {pipeline_mode = #tpu.pipeline_mode<synchronous>, transform_indices = @transform_6, window_bounds = array<i64: 4, 1, 32>}, {pipeline_mode = #tpu.pipeline_mode<synchronous>, transform_indices = @transform_7, window_bounds = array<i64: 4, 128, 32>}, {pipeline_mode = #tpu.pipeline_mode<synchronous>, transform_indices = @transform_8, window_bounds = array<i64: 4, 1, 32>}, {pipeline_mode = #tpu.pipeline_mode<synchronous>, transform_indices = @transform_9, window_bounds = array<i64: 4, 32, 128>}, {pipeline_mode = #tpu.pipeline_mode<synchronous>, transform_indices = @transform_10, window_bounds = array<i64: 1, 128>}, {pipeline_mode = #tpu.pipeline_mode<synchronous>, transform_indices = @transform_11, window_bounds = array<i64: 128, 128>}, {pipeline_mode = #tpu.pipeline_mode<synchronous>, transform_indices = @transform_12, window_bounds = array<i64: 1, 128>}, {pipeline_mode = #tpu.pipeline_mode<synchronous>, transform_indices = @transform_13, window_bounds = array<i64: 128, 128>}, {pipeline_mode = #tpu.pipeline_mode<synchronous>, transform_indices = @transform_14, window_bounds = array<i64: 1, 128>}, {transform_indices = @transform_15, window_bounds = array<i64: 1, 8, 128>}]} {
    %c0 = arith.constant 0 : index
    %c0_0 = arith.constant 0 : index
    %c0_1 = arith.constant 0 : index
    %0 = vector.load %arg1[%c0, %c0_0, %c0_1] : memref<1x8x128xf32, #tpu.memory_space<vmem>>, vector<1x8x128xf32>
    %1 = vector.shape_cast %0 : vector<1x8x128xf32> to vector<8x128xf32>
    %c0_2 = arith.constant 0 : index
    %c0_3 = arith.constant 0 : index
    %2 = vector.load %arg2[%c0_2, %c0_3] : memref<1x128xf32, #tpu.memory_space<vmem>>, vector<1x128xf32>
    %c0_4 = arith.constant 0 : index
    %c0_5 = arith.constant 0 : index
    %3 = vector.load %arg3[%c0_4, %c0_5] : memref<1x128xf32, #tpu.memory_space<vmem>>, vector<1x128xf32>
    %cst = arith.constant dense<0.000000e+00> : vector<8xf32>
    %4 = vector.multi_reduction <add>, %1, %cst [1] : vector<8x128xf32> to vector<8xf32>
    %5 = vector.shape_cast %4 : vector<8xf32> to vector<8x1xf32>
    %cst_6 = arith.constant 1.280000e+02 : f32
    %6 = vector.broadcast %cst_6 : f32 to vector<8x1xf32>
    %7 = arith.divf %5, %6 : vector<8x1xf32>
    %8 = vector.broadcast %7 : vector<8x1xf32> to vector<8x128xf32>
    %9 = arith.subf %1, %8 : vector<8x128xf32>
    %10 = arith.mulf %9, %9 : vector<8x128xf32>
    %cst_7 = arith.constant dense<0.000000e+00> : vector<8xf32>
    %11 = vector.multi_reduction <add>, %10, %cst_7 [1] : vector<8x128xf32> to vector<8xf32>
    %12 = vector.shape_cast %11 : vector<8xf32> to vector<8x1xf32>
    %cst_8 = arith.constant 1.280000e+02 : f32
    %13 = vector.broadcast %cst_8 : f32 to vector<8x1xf32>
    %14 = arith.divf %12, %13 : vector<8x1xf32>
    %15 = vector.broadcast %7 : vector<8x1xf32> to vector<8x128xf32>
    %16 = arith.subf %1, %15 : vector<8x128xf32>
    %cst_9 = arith.constant 9.99999974E-6 : f32
    %17 = vector.broadcast %cst_9 : f32 to vector<8x1xf32>
    %18 = arith.addf %14, %17 : vector<8x1xf32>
    %19 = math.rsqrt %18 : vector<8x1xf32>
    %20 = vector.broadcast %19 : vector<8x1xf32> to vector<8x128xf32>
    %21 = arith.mulf %16, %20 : vector<8x128xf32>
    %22 = vector.broadcast %2 : vector<1x128xf32> to vector<8x128xf32>
    %23 = arith.mulf %21, %22 : vector<8x128xf32>
    %24 = vector.broadcast %3 : vector<1x128xf32> to vector<8x128xf32>
    %25 = arith.addf %23, %24 : vector<8x128xf32>
    %c0_10 = arith.constant 0 : index
    %c0_11 = arith.constant 0 : index
    %26 = vector.load %arg11[%c0_10, %c0_11] : memref<1x128xf32, #tpu.memory_space<vmem>>, vector<1x128xf32>
    %27 = vector.shape_cast %26 : vector<1x128xf32> to vector<1x128xf32>
    %28 = vector.broadcast %27 : vector<1x128xf32> to vector<8x128xf32>
    %c0_12 = arith.constant 0 : index
    %c0_13 = arith.constant 0 : index
    %c0_14 = arith.constant 0 : index
    %29 = vector.load %arg4[%c0_12, %c0_13, %c0_14] : memref<4x128x32xbf16, #tpu.memory_space<vmem>>, vector<1x128x32xbf16>
    %30 = vector.shape_cast %29 : vector<1x128x32xbf16> to vector<128x32xbf16>
    %31 = arith.truncf %25 : vector<8x128xf32> to vector<8x128xbf16>
    %cst_15 = arith.constant dense<0.000000e+00> : vector<8x32xf32>
    %32 = tpu.matmul %31, %30, %cst_15 {dimension_numbers = #tpu.dot_dimension_numbers<[1], [0], [0], [1], [0, 0, 1, 1], [], []>} : vector<8x128xbf16>, vector<128x32xbf16>, vector<8x32xf32> -> vector<8x32xf32>
    %c0_16 = arith.constant 0 : index
    %c0_17 = arith.constant 0 : index
    %c0_18 = arith.constant 0 : index
    %33 = vector.load %arg5[%c0_16, %c0_17, %c0_18] : memref<4x1x32xf32, #tpu.memory_space<vmem>>, vector<1x1x32xf32>
    %34 = vector.shape_cast %33 : vector<1x1x32xf32> to vector<1x32xf32>
    %35 = vector.broadcast %34 : vector<1x32xf32> to vector<8x32xf32>
    %36 = arith.addf %32, %35 : vector<8x32xf32>
    %c0_19 = arith.constant 0 : index
    %c0_20 = arith.constant 0 : index
    %c0_21 = arith.constant 0 : index
    %37 = vector.load %arg6[%c0_19, %c0_20, %c0_21] : memref<4x128x32xbf16, #tpu.memory_space<vmem>>, vector<1x128x32xbf16>
    %38 = vector.shape_cast %37 : vector<1x128x32xbf16> to vector<128x32xbf16>
    %39 = arith.truncf %25 : vector<8x128xf32> to vector<8x128xbf16>
    %cst_22 = arith.constant dense<0.000000e+00> : vector<8x32xf32>
    %40 = tpu.matmul %39, %38, %cst_22 {dimension_numbers = #tpu.dot_dimension_numbers<[1], [0], [0], [1], [0, 0, 1, 1], [], []>} : vector<8x128xbf16>, vector<128x32xbf16>, vector<8x32xf32> -> vector<8x32xf32>
    %c0_23 = arith.constant 0 : index
    %c0_24 = arith.constant 0 : index
    %c0_25 = arith.constant 0 : index
    %41 = vector.load %arg7[%c0_23, %c0_24, %c0_25] : memref<4x1x32xf32, #tpu.memory_space<vmem>>, vector<1x1x32xf32>
    %42 = vector.shape_cast %41 : vector<1x1x32xf32> to vector<1x32xf32>
    %43 = vector.broadcast %42 : vector<1x32xf32> to vector<8x32xf32>
    %44 = arith.addf %40, %43 : vector<8x32xf32>
    %c0_26 = arith.constant 0 : index
    %c0_27 = arith.constant 0 : index
    %c0_28 = arith.constant 0 : index
    %45 = vector.load %arg8[%c0_26, %c0_27, %c0_28] : memref<4x128x32xbf16, #tpu.memory_space<vmem>>, vector<1x128x32xbf16>
    %46 = vector.shape_cast %45 : vector<1x128x32xbf16> to vector<128x32xbf16>
    %47 = arith.truncf %25 : vector<8x128xf32> to vector<8x128xbf16>
    %cst_29 = arith.constant dense<0.000000e+00> : vector<8x32xf32>
    %48 = tpu.matmul %47, %46, %cst_29 {dimension_numbers = #tpu.dot_dimension_numbers<[1], [0], [0], [1], [0, 0, 1, 1], [], []>} : vector<8x128xbf16>, vector<128x32xbf16>, vector<8x32xf32> -> vector<8x32xf32>
    %c0_30 = arith.constant 0 : index
    %c0_31 = arith.constant 0 : index
    %c0_32 = arith.constant 0 : index
    %49 = vector.load %arg9[%c0_30, %c0_31, %c0_32] : memref<4x1x32xf32, #tpu.memory_space<vmem>>, vector<1x1x32xf32>
    %50 = vector.shape_cast %49 : vector<1x1x32xf32> to vector<1x32xf32>
    %51 = vector.broadcast %50 : vector<1x32xf32> to vector<8x32xf32>
    %52 = arith.addf %48, %51 : vector<8x32xf32>
    %53 = arith.truncf %36 : vector<8x32xf32> to vector<8x32xbf16>
    %54 = arith.truncf %44 : vector<8x32xf32> to vector<8x32xbf16>
    %cst_33 = arith.constant dense<0.000000e+00> : vector<8x8xf32>
    %55 = tpu.matmul %53, %54, %cst_33 {dimension_numbers = #tpu.dot_dimension_numbers<[1], [1], [0], [0], [0, 0, 1, 0], [], []>} : vector<8x32xbf16>, vector<8x32xbf16>, vector<8x8xf32> -> vector<8x8xf32>
    %cst_34 = arith.constant dense<0xFF800000> : vector<8xf32>
    %56 = vector.multi_reduction <maximumf>, %55, %cst_34 [1] : vector<8x8xf32> to vector<8xf32>
    %57 = vector.shape_cast %56 : vector<8xf32> to vector<8x1xf32>
    %58 = vector.broadcast %57 : vector<8x1xf32> to vector<8x8xf32>
    %59 = arith.subf %55, %58 : vector<8x8xf32>
    %60 = math.exp %59 : vector<8x8xf32>
    %cst_35 = arith.constant dense<0.000000e+00> : vector<8xf32>
    %61 = vector.multi_reduction <add>, %60, %cst_35 [1] : vector<8x8xf32> to vector<8xf32>
    %62 = vector.shape_cast %61 : vector<8xf32> to vector<8x1xf32>
    %63 = tpu.reciprocal %62 {approx = true} : vector<8x1xf32> -> vector<8x1xf32>
    %64 = vector.broadcast %63 : vector<8x1xf32> to vector<8x8xf32>
    %65 = arith.mulf %60, %64 : vector<8x8xf32>
    %66 = arith.truncf %65 : vector<8x8xf32> to vector<8x8xbf16>
    %67 = arith.truncf %52 : vector<8x32xf32> to vector<8x32xbf16>
    %cst_36 = arith.constant dense<0.000000e+00> : vector<8x32xf32>
    %68 = tpu.matmul %66, %67, %cst_36 {dimension_numbers = #tpu.dot_dimension_numbers<[1], [0], [0], [1], [0, 0, 1, 1], [], []>} : vector<8x8xbf16>, vector<8x32xbf16>, vector<8x32xf32> -> vector<8x32xf32>
    %c0_37 = arith.constant 0 : index
    %c0_38 = arith.constant 0 : index
    %c0_39 = arith.constant 0 : index
    %69 = vector.load %arg10[%c0_37, %c0_38, %c0_39] : memref<4x32x128xbf16, #tpu.memory_space<vmem>>, vector<1x32x128xbf16>
    %70 = vector.shape_cast %69 : vector<1x32x128xbf16> to vector<32x128xbf16>
    %71 = arith.truncf %68 : vector<8x32xf32> to vector<8x32xbf16>
    %cst_40 = arith.constant dense<0.000000e+00> : vector<8x128xf32>
    %72 = tpu.matmul %71, %70, %cst_40 {dimension_numbers = #tpu.dot_dimension_numbers<[1], [0], [0], [1], [0, 0, 1, 1], [], []>} : vector<8x32xbf16>, vector<32x128xbf16>, vector<8x128xf32> -> vector<8x128xf32>
    %73 = arith.addf %28, %72 : vector<8x128xf32>
    %c1 = arith.constant 1 : index
    %c0_41 = arith.constant 0 : index
    %c0_42 = arith.constant 0 : index
    %74 = vector.load %arg4[%c1, %c0_41, %c0_42] : memref<4x128x32xbf16, #tpu.memory_space<vmem>>, vector<1x128x32xbf16>
    %75 = vector.shape_cast %74 : vector<1x128x32xbf16> to vector<128x32xbf16>
    %76 = arith.truncf %25 : vector<8x128xf32> to vector<8x128xbf16>
    %cst_43 = arith.constant dense<0.000000e+00> : vector<8x32xf32>
    %77 = tpu.matmul %76, %75, %cst_43 {dimension_numbers = #tpu.dot_dimension_numbers<[1], [0], [0], [1], [0, 0, 1, 1], [], []>} : vector<8x128xbf16>, vector<128x32xbf16>, vector<8x32xf32> -> vector<8x32xf32>
    %c1_44 = arith.constant 1 : index
    %c0_45 = arith.constant 0 : index
    %c0_46 = arith.constant 0 : index
    %78 = vector.load %arg5[%c1_44, %c0_45, %c0_46] : memref<4x1x32xf32, #tpu.memory_space<vmem>>, vector<1x1x32xf32>
    %79 = vector.shape_cast %78 : vector<1x1x32xf32> to vector<1x32xf32>
    %80 = vector.broadcast %79 : vector<1x32xf32> to vector<8x32xf32>
    %81 = arith.addf %77, %80 : vector<8x32xf32>
    %c1_47 = arith.constant 1 : index
    %c0_48 = arith.constant 0 : index
    %c0_49 = arith.constant 0 : index
    %82 = vector.load %arg6[%c1_47, %c0_48, %c0_49] : memref<4x128x32xbf16, #tpu.memory_space<vmem>>, vector<1x128x32xbf16>
    %83 = vector.shape_cast %82 : vector<1x128x32xbf16> to vector<128x32xbf16>
    %84 = arith.truncf %25 : vector<8x128xf32> to vector<8x128xbf16>
    %cst_50 = arith.constant dense<0.000000e+00> : vector<8x32xf32>
    %85 = tpu.matmul %84, %83, %cst_50 {dimension_numbers = #tpu.dot_dimension_numbers<[1], [0], [0], [1], [0, 0, 1, 1], [], []>} : vector<8x128xbf16>, vector<128x32xbf16>, vector<8x32xf32> -> vector<8x32xf32>
    %c1_51 = arith.constant 1 : index
    %c0_52 = arith.constant 0 : index
    %c0_53 = arith.constant 0 : index
    %86 = vector.load %arg7[%c1_51, %c0_52, %c0_53] : memref<4x1x32xf32, #tpu.memory_space<vmem>>, vector<1x1x32xf32>
    %87 = vector.shape_cast %86 : vector<1x1x32xf32> to vector<1x32xf32>
    %88 = vector.broadcast %87 : vector<1x32xf32> to vector<8x32xf32>
    %89 = arith.addf %85, %88 : vector<8x32xf32>
    %c1_54 = arith.constant 1 : index
    %c0_55 = arith.constant 0 : index
    %c0_56 = arith.constant 0 : index
    %90 = vector.load %arg8[%c1_54, %c0_55, %c0_56] : memref<4x128x32xbf16, #tpu.memory_space<vmem>>, vector<1x128x32xbf16>
    %91 = vector.shape_cast %90 : vector<1x128x32xbf16> to vector<128x32xbf16>
    %92 = arith.truncf %25 : vector<8x128xf32> to vector<8x128xbf16>
    %cst_57 = arith.constant dense<0.000000e+00> : vector<8x32xf32>
    %93 = tpu.matmul %92, %91, %cst_57 {dimension_numbers = #tpu.dot_dimension_numbers<[1], [0], [0], [1], [0, 0, 1, 1], [], []>} : vector<8x128xbf16>, vector<128x32xbf16>, vector<8x32xf32> -> vector<8x32xf32>
    %c1_58 = arith.constant 1 : index
    %c0_59 = arith.constant 0 : index
    %c0_60 = arith.constant 0 : index
    %94 = vector.load %arg9[%c1_58, %c0_59, %c0_60] : memref<4x1x32xf32, #tpu.memory_space<vmem>>, vector<1x1x32xf32>
    %95 = vector.shape_cast %94 : vector<1x1x32xf32> to vector<1x32xf32>
    %96 = vector.broadcast %95 : vector<1x32xf32> to vector<8x32xf32>
    %97 = arith.addf %93, %96 : vector<8x32xf32>
    %98 = arith.truncf %81 : vector<8x32xf32> to vector<8x32xbf16>
    %99 = arith.truncf %89 : vector<8x32xf32> to vector<8x32xbf16>
    %cst_61 = arith.constant dense<0.000000e+00> : vector<8x8xf32>
    %100 = tpu.matmul %98, %99, %cst_61 {dimension_numbers = #tpu.dot_dimension_numbers<[1], [1], [0], [0], [0, 0, 1, 0], [], []>} : vector<8x32xbf16>, vector<8x32xbf16>, vector<8x8xf32> -> vector<8x8xf32>
    %cst_62 = arith.constant dense<0xFF800000> : vector<8xf32>
    %101 = vector.multi_reduction <maximumf>, %100, %cst_62 [1] : vector<8x8xf32> to vector<8xf32>
    %102 = vector.shape_cast %101 : vector<8xf32> to vector<8x1xf32>
    %103 = vector.broadcast %102 : vector<8x1xf32> to vector<8x8xf32>
    %104 = arith.subf %100, %103 : vector<8x8xf32>
    %105 = math.exp %104 : vector<8x8xf32>
    %cst_63 = arith.constant dense<0.000000e+00> : vector<8xf32>
    %106 = vector.multi_reduction <add>, %105, %cst_63 [1] : vector<8x8xf32> to vector<8xf32>
    %107 = vector.shape_cast %106 : vector<8xf32> to vector<8x1xf32>
    %108 = tpu.reciprocal %107 {approx = true} : vector<8x1xf32> -> vector<8x1xf32>
    %109 = vector.broadcast %108 : vector<8x1xf32> to vector<8x8xf32>
    %110 = arith.mulf %105, %109 : vector<8x8xf32>
    %111 = arith.truncf %110 : vector<8x8xf32> to vector<8x8xbf16>
    %112 = arith.truncf %97 : vector<8x32xf32> to vector<8x32xbf16>
    %cst_64 = arith.constant dense<0.000000e+00> : vector<8x32xf32>
    %113 = tpu.matmul %111, %112, %cst_64 {dimension_numbers = #tpu.dot_dimension_numbers<[1], [0], [0], [1], [0, 0, 1, 1], [], []>} : vector<8x8xbf16>, vector<8x32xbf16>, vector<8x32xf32> -> vector<8x32xf32>
    %c1_65 = arith.constant 1 : index
    %c0_66 = arith.constant 0 : index
    %c0_67 = arith.constant 0 : index
    %114 = vector.load %arg10[%c1_65, %c0_66, %c0_67] : memref<4x32x128xbf16, #tpu.memory_space<vmem>>, vector<1x32x128xbf16>
    %115 = vector.shape_cast %114 : vector<1x32x128xbf16> to vector<32x128xbf16>
    %116 = arith.truncf %113 : vector<8x32xf32> to vector<8x32xbf16>
    %cst_68 = arith.constant dense<0.000000e+00> : vector<8x128xf32>
    %117 = tpu.matmul %116, %115, %cst_68 {dimension_numbers = #tpu.dot_dimension_numbers<[1], [0], [0], [1], [0, 0, 1, 1], [], []>} : vector<8x32xbf16>, vector<32x128xbf16>, vector<8x128xf32> -> vector<8x128xf32>
    %118 = arith.addf %73, %117 : vector<8x128xf32>
    %c2 = arith.constant 2 : index
    %c0_69 = arith.constant 0 : index
    %c0_70 = arith.constant 0 : index
    %119 = vector.load %arg4[%c2, %c0_69, %c0_70] : memref<4x128x32xbf16, #tpu.memory_space<vmem>>, vector<1x128x32xbf16>
    %120 = vector.shape_cast %119 : vector<1x128x32xbf16> to vector<128x32xbf16>
    %121 = arith.truncf %25 : vector<8x128xf32> to vector<8x128xbf16>
    %cst_71 = arith.constant dense<0.000000e+00> : vector<8x32xf32>
    %122 = tpu.matmul %121, %120, %cst_71 {dimension_numbers = #tpu.dot_dimension_numbers<[1], [0], [0], [1], [0, 0, 1, 1], [], []>} : vector<8x128xbf16>, vector<128x32xbf16>, vector<8x32xf32> -> vector<8x32xf32>
    %c2_72 = arith.constant 2 : index
    %c0_73 = arith.constant 0 : index
    %c0_74 = arith.constant 0 : index
    %123 = vector.load %arg5[%c2_72, %c0_73, %c0_74] : memref<4x1x32xf32, #tpu.memory_space<vmem>>, vector<1x1x32xf32>
    %124 = vector.shape_cast %123 : vector<1x1x32xf32> to vector<1x32xf32>
    %125 = vector.broadcast %124 : vector<1x32xf32> to vector<8x32xf32>
    %126 = arith.addf %122, %125 : vector<8x32xf32>
    %c2_75 = arith.constant 2 : index
    %c0_76 = arith.constant 0 : index
    %c0_77 = arith.constant 0 : index
    %127 = vector.load %arg6[%c2_75, %c0_76, %c0_77] : memref<4x128x32xbf16, #tpu.memory_space<vmem>>, vector<1x128x32xbf16>
    %128 = vector.shape_cast %127 : vector<1x128x32xbf16> to vector<128x32xbf16>
    %129 = arith.truncf %25 : vector<8x128xf32> to vector<8x128xbf16>
    %cst_78 = arith.constant dense<0.000000e+00> : vector<8x32xf32>
    %130 = tpu.matmul %129, %128, %cst_78 {dimension_numbers = #tpu.dot_dimension_numbers<[1], [0], [0], [1], [0, 0, 1, 1], [], []>} : vector<8x128xbf16>, vector<128x32xbf16>, vector<8x32xf32> -> vector<8x32xf32>
    %c2_79 = arith.constant 2 : index
    %c0_80 = arith.constant 0 : index
    %c0_81 = arith.constant 0 : index
    %131 = vector.load %arg7[%c2_79, %c0_80, %c0_81] : memref<4x1x32xf32, #tpu.memory_space<vmem>>, vector<1x1x32xf32>
    %132 = vector.shape_cast %131 : vector<1x1x32xf32> to vector<1x32xf32>
    %133 = vector.broadcast %132 : vector<1x32xf32> to vector<8x32xf32>
    %134 = arith.addf %130, %133 : vector<8x32xf32>
    %c2_82 = arith.constant 2 : index
    %c0_83 = arith.constant 0 : index
    %c0_84 = arith.constant 0 : index
    %135 = vector.load %arg8[%c2_82, %c0_83, %c0_84] : memref<4x128x32xbf16, #tpu.memory_space<vmem>>, vector<1x128x32xbf16>
    %136 = vector.shape_cast %135 : vector<1x128x32xbf16> to vector<128x32xbf16>
    %137 = arith.truncf %25 : vector<8x128xf32> to vector<8x128xbf16>
    %cst_85 = arith.constant dense<0.000000e+00> : vector<8x32xf32>
    %138 = tpu.matmul %137, %136, %cst_85 {dimension_numbers = #tpu.dot_dimension_numbers<[1], [0], [0], [1], [0, 0, 1, 1], [], []>} : vector<8x128xbf16>, vector<128x32xbf16>, vector<8x32xf32> -> vector<8x32xf32>
    %c2_86 = arith.constant 2 : index
    %c0_87 = arith.constant 0 : index
    %c0_88 = arith.constant 0 : index
    %139 = vector.load %arg9[%c2_86, %c0_87, %c0_88] : memref<4x1x32xf32, #tpu.memory_space<vmem>>, vector<1x1x32xf32>
    %140 = vector.shape_cast %139 : vector<1x1x32xf32> to vector<1x32xf32>
    %141 = vector.broadcast %140 : vector<1x32xf32> to vector<8x32xf32>
    %142 = arith.addf %138, %141 : vector<8x32xf32>
    %143 = arith.truncf %126 : vector<8x32xf32> to vector<8x32xbf16>
    %144 = arith.truncf %134 : vector<8x32xf32> to vector<8x32xbf16>
    %cst_89 = arith.constant dense<0.000000e+00> : vector<8x8xf32>
    %145 = tpu.matmul %143, %144, %cst_89 {dimension_numbers = #tpu.dot_dimension_numbers<[1], [1], [0], [0], [0, 0, 1, 0], [], []>} : vector<8x32xbf16>, vector<8x32xbf16>, vector<8x8xf32> -> vector<8x8xf32>
    %cst_90 = arith.constant dense<0xFF800000> : vector<8xf32>
    %146 = vector.multi_reduction <maximumf>, %145, %cst_90 [1] : vector<8x8xf32> to vector<8xf32>
    %147 = vector.shape_cast %146 : vector<8xf32> to vector<8x1xf32>
    %148 = vector.broadcast %147 : vector<8x1xf32> to vector<8x8xf32>
    %149 = arith.subf %145, %148 : vector<8x8xf32>
    %150 = math.exp %149 : vector<8x8xf32>
    %cst_91 = arith.constant dense<0.000000e+00> : vector<8xf32>
    %151 = vector.multi_reduction <add>, %150, %cst_91 [1] : vector<8x8xf32> to vector<8xf32>
    %152 = vector.shape_cast %151 : vector<8xf32> to vector<8x1xf32>
    %153 = tpu.reciprocal %152 {approx = true} : vector<8x1xf32> -> vector<8x1xf32>
    %154 = vector.broadcast %153 : vector<8x1xf32> to vector<8x8xf32>
    %155 = arith.mulf %150, %154 : vector<8x8xf32>
    %156 = arith.truncf %155 : vector<8x8xf32> to vector<8x8xbf16>
    %157 = arith.truncf %142 : vector<8x32xf32> to vector<8x32xbf16>
    %cst_92 = arith.constant dense<0.000000e+00> : vector<8x32xf32>
    %158 = tpu.matmul %156, %157, %cst_92 {dimension_numbers = #tpu.dot_dimension_numbers<[1], [0], [0], [1], [0, 0, 1, 1], [], []>} : vector<8x8xbf16>, vector<8x32xbf16>, vector<8x32xf32> -> vector<8x32xf32>
    %c2_93 = arith.constant 2 : index
    %c0_94 = arith.constant 0 : index
    %c0_95 = arith.constant 0 : index
    %159 = vector.load %arg10[%c2_93, %c0_94, %c0_95] : memref<4x32x128xbf16, #tpu.memory_space<vmem>>, vector<1x32x128xbf16>
    %160 = vector.shape_cast %159 : vector<1x32x128xbf16> to vector<32x128xbf16>
    %161 = arith.truncf %158 : vector<8x32xf32> to vector<8x32xbf16>
    %cst_96 = arith.constant dense<0.000000e+00> : vector<8x128xf32>
    %162 = tpu.matmul %161, %160, %cst_96 {dimension_numbers = #tpu.dot_dimension_numbers<[1], [0], [0], [1], [0, 0, 1, 1], [], []>} : vector<8x32xbf16>, vector<32x128xbf16>, vector<8x128xf32> -> vector<8x128xf32>
    %163 = arith.addf %118, %162 : vector<8x128xf32>
    %c3 = arith.constant 3 : index
    %c0_97 = arith.constant 0 : index
    %c0_98 = arith.constant 0 : index
    %164 = vector.load %arg4[%c3, %c0_97, %c0_98] : memref<4x128x32xbf16, #tpu.memory_space<vmem>>, vector<1x128x32xbf16>
    %165 = vector.shape_cast %164 : vector<1x128x32xbf16> to vector<128x32xbf16>
    %166 = arith.truncf %25 : vector<8x128xf32> to vector<8x128xbf16>
    %cst_99 = arith.constant dense<0.000000e+00> : vector<8x32xf32>
    %167 = tpu.matmul %166, %165, %cst_99 {dimension_numbers = #tpu.dot_dimension_numbers<[1], [0], [0], [1], [0, 0, 1, 1], [], []>} : vector<8x128xbf16>, vector<128x32xbf16>, vector<8x32xf32> -> vector<8x32xf32>
    %c3_100 = arith.constant 3 : index
    %c0_101 = arith.constant 0 : index
    %c0_102 = arith.constant 0 : index
    %168 = vector.load %arg5[%c3_100, %c0_101, %c0_102] : memref<4x1x32xf32, #tpu.memory_space<vmem>>, vector<1x1x32xf32>
    %169 = vector.shape_cast %168 : vector<1x1x32xf32> to vector<1x32xf32>
    %170 = vector.broadcast %169 : vector<1x32xf32> to vector<8x32xf32>
    %171 = arith.addf %167, %170 : vector<8x32xf32>
    %c3_103 = arith.constant 3 : index
    %c0_104 = arith.constant 0 : index
    %c0_105 = arith.constant 0 : index
    %172 = vector.load %arg6[%c3_103, %c0_104, %c0_105] : memref<4x128x32xbf16, #tpu.memory_space<vmem>>, vector<1x128x32xbf16>
    %173 = vector.shape_cast %172 : vector<1x128x32xbf16> to vector<128x32xbf16>
    %174 = arith.truncf %25 : vector<8x128xf32> to vector<8x128xbf16>
    %cst_106 = arith.constant dense<0.000000e+00> : vector<8x32xf32>
    %175 = tpu.matmul %174, %173, %cst_106 {dimension_numbers = #tpu.dot_dimension_numbers<[1], [0], [0], [1], [0, 0, 1, 1], [], []>} : vector<8x128xbf16>, vector<128x32xbf16>, vector<8x32xf32> -> vector<8x32xf32>
    %c3_107 = arith.constant 3 : index
    %c0_108 = arith.constant 0 : index
    %c0_109 = arith.constant 0 : index
    %176 = vector.load %arg7[%c3_107, %c0_108, %c0_109] : memref<4x1x32xf32, #tpu.memory_space<vmem>>, vector<1x1x32xf32>
    %177 = vector.shape_cast %176 : vector<1x1x32xf32> to vector<1x32xf32>
    %178 = vector.broadcast %177 : vector<1x32xf32> to vector<8x32xf32>
    %179 = arith.addf %175, %178 : vector<8x32xf32>
    %c3_110 = arith.constant 3 : index
    %c0_111 = arith.constant 0 : index
    %c0_112 = arith.constant 0 : index
    %180 = vector.load %arg8[%c3_110, %c0_111, %c0_112] : memref<4x128x32xbf16, #tpu.memory_space<vmem>>, vector<1x128x32xbf16>
    %181 = vector.shape_cast %180 : vector<1x128x32xbf16> to vector<128x32xbf16>
    %182 = arith.truncf %25 : vector<8x128xf32> to vector<8x128xbf16>
    %cst_113 = arith.constant dense<0.000000e+00> : vector<8x32xf32>
    %183 = tpu.matmul %182, %181, %cst_113 {dimension_numbers = #tpu.dot_dimension_numbers<[1], [0], [0], [1], [0, 0, 1, 1], [], []>} : vector<8x128xbf16>, vector<128x32xbf16>, vector<8x32xf32> -> vector<8x32xf32>
    %c3_114 = arith.constant 3 : index
    %c0_115 = arith.constant 0 : index
    %c0_116 = arith.constant 0 : index
    %184 = vector.load %arg9[%c3_114, %c0_115, %c0_116] : memref<4x1x32xf32, #tpu.memory_space<vmem>>, vector<1x1x32xf32>
    %185 = vector.shape_cast %184 : vector<1x1x32xf32> to vector<1x32xf32>
    %186 = vector.broadcast %185 : vector<1x32xf32> to vector<8x32xf32>
    %187 = arith.addf %183, %186 : vector<8x32xf32>
    %188 = arith.truncf %171 : vector<8x32xf32> to vector<8x32xbf16>
    %189 = arith.truncf %179 : vector<8x32xf32> to vector<8x32xbf16>
    %cst_117 = arith.constant dense<0.000000e+00> : vector<8x8xf32>
    %190 = tpu.matmul %188, %189, %cst_117 {dimension_numbers = #tpu.dot_dimension_numbers<[1], [1], [0], [0], [0, 0, 1, 0], [], []>} : vector<8x32xbf16>, vector<8x32xbf16>, vector<8x8xf32> -> vector<8x8xf32>
    %cst_118 = arith.constant dense<0xFF800000> : vector<8xf32>
    %191 = vector.multi_reduction <maximumf>, %190, %cst_118 [1] : vector<8x8xf32> to vector<8xf32>
    %192 = vector.shape_cast %191 : vector<8xf32> to vector<8x1xf32>
    %193 = vector.broadcast %192 : vector<8x1xf32> to vector<8x8xf32>
    %194 = arith.subf %190, %193 : vector<8x8xf32>
    %195 = math.exp %194 : vector<8x8xf32>
    %cst_119 = arith.constant dense<0.000000e+00> : vector<8xf32>
    %196 = vector.multi_reduction <add>, %195, %cst_119 [1] : vector<8x8xf32> to vector<8xf32>
    %197 = vector.shape_cast %196 : vector<8xf32> to vector<8x1xf32>
    %198 = tpu.reciprocal %197 {approx = true} : vector<8x1xf32> -> vector<8x1xf32>
    %199 = vector.broadcast %198 : vector<8x1xf32> to vector<8x8xf32>
    %200 = arith.mulf %195, %199 : vector<8x8xf32>
    %201 = arith.truncf %200 : vector<8x8xf32> to vector<8x8xbf16>
    %202 = arith.truncf %187 : vector<8x32xf32> to vector<8x32xbf16>
    %cst_120 = arith.constant dense<0.000000e+00> : vector<8x32xf32>
    %203 = tpu.matmul %201, %202, %cst_120 {dimension_numbers = #tpu.dot_dimension_numbers<[1], [0], [0], [1], [0, 0, 1, 1], [], []>} : vector<8x8xbf16>, vector<8x32xbf16>, vector<8x32xf32> -> vector<8x32xf32>
    %c3_121 = arith.constant 3 : index
    %c0_122 = arith.constant 0 : index
    %c0_123 = arith.constant 0 : index
    %204 = vector.load %arg10[%c3_121, %c0_122, %c0_123] : memref<4x32x128xbf16, #tpu.memory_space<vmem>>, vector<1x32x128xbf16>
    %205 = vector.shape_cast %204 : vector<1x32x128xbf16> to vector<32x128xbf16>
    %206 = arith.truncf %203 : vector<8x32xf32> to vector<8x32xbf16>
    %cst_124 = arith.constant dense<0.000000e+00> : vector<8x128xf32>
    %207 = tpu.matmul %206, %205, %cst_124 {dimension_numbers = #tpu.dot_dimension_numbers<[1], [0], [0], [1], [0, 0, 1, 1], [], []>} : vector<8x32xbf16>, vector<32x128xbf16>, vector<8x128xf32> -> vector<8x128xf32>
    %208 = arith.addf %163, %207 : vector<8x128xf32>
    %209 = arith.addf %208, %1 : vector<8x128xf32>
    %cst_125 = arith.constant dense<0.000000e+00> : vector<8xf32>
    %210 = vector.multi_reduction <add>, %209, %cst_125 [1] : vector<8x128xf32> to vector<8xf32>
    %211 = vector.shape_cast %210 : vector<8xf32> to vector<8x1xf32>
    %cst_126 = arith.constant 1.280000e+02 : f32
    %212 = vector.broadcast %cst_126 : f32 to vector<8x1xf32>
    %213 = arith.divf %211, %212 : vector<8x1xf32>
    %214 = vector.broadcast %213 : vector<8x1xf32> to vector<8x128xf32>
    %215 = arith.subf %209, %214 : vector<8x128xf32>
    %216 = arith.mulf %215, %215 : vector<8x128xf32>
    %cst_127 = arith.constant dense<0.000000e+00> : vector<8xf32>
    %217 = vector.multi_reduction <add>, %216, %cst_127 [1] : vector<8x128xf32> to vector<8xf32>
    %218 = vector.shape_cast %217 : vector<8xf32> to vector<8x1xf32>
    %cst_128 = arith.constant 1.280000e+02 : f32
    %219 = vector.broadcast %cst_128 : f32 to vector<8x1xf32>
    %220 = arith.divf %218, %219 : vector<8x1xf32>
    %221 = vector.broadcast %213 : vector<8x1xf32> to vector<8x128xf32>
    %222 = arith.subf %209, %221 : vector<8x128xf32>
    %cst_129 = arith.constant 9.99999974E-6 : f32
    %223 = vector.broadcast %cst_129 : f32 to vector<8x1xf32>
    %224 = arith.addf %220, %223 : vector<8x1xf32>
    %225 = math.rsqrt %224 : vector<8x1xf32>
    %226 = vector.broadcast %225 : vector<8x1xf32> to vector<8x128xf32>
    %227 = arith.mulf %222, %226 : vector<8x128xf32>
    %228 = vector.broadcast %2 : vector<1x128xf32> to vector<8x128xf32>
    %229 = arith.mulf %227, %228 : vector<8x128xf32>
    %230 = vector.broadcast %3 : vector<1x128xf32> to vector<8x128xf32>
    %231 = arith.addf %229, %230 : vector<8x128xf32>
    %c0_130 = arith.constant 0 : index
    %c0_131 = arith.constant 0 : index
    %232 = vector.load %arg12[%c0_130, %c0_131] : memref<128x128xbf16, #tpu.memory_space<vmem>>, vector<128x128xbf16>
    %233 = arith.truncf %231 : vector<8x128xf32> to vector<8x128xbf16>
    %cst_132 = arith.constant dense<0.000000e+00> : vector<8x128xf32>
    %234 = tpu.matmul %233, %232, %cst_132 {dimension_numbers = #tpu.dot_dimension_numbers<[1], [0], [0], [1], [0, 0, 1, 1], [], []>} : vector<8x128xbf16>, vector<128x128xbf16>, vector<8x128xf32> -> vector<8x128xf32>
    %c0_133 = arith.constant 0 : index
    %c0_134 = arith.constant 0 : index
    %235 = vector.load %arg13[%c0_133, %c0_134] : memref<1x128xf32, #tpu.memory_space<vmem>>, vector<1x128xf32>
    %236 = vector.broadcast %235 : vector<1x128xf32> to vector<8x128xf32>
    %237 = arith.addf %234, %236 : vector<8x128xf32>
    %cst_135 = arith.constant 5.000000e-01 : f32
    %238 = vector.broadcast %cst_135 : f32 to vector<8x128xf32>
    %239 = arith.mulf %238, %237 : vector<8x128xf32>
    %cst_136 = arith.constant 0.707106769 : f32
    %240 = vector.broadcast %cst_136 : f32 to vector<8x128xf32>
    %241 = arith.mulf %237, %240 : vector<8x128xf32>
    %242 = math.absf %241 : vector<8x128xf32>
    %cst_137 = arith.constant 0.327591091 : f32
    %243 = vector.broadcast %cst_137 : f32 to vector<8x128xf32>
    %244 = arith.mulf %243, %242 : vector<8x128xf32>
    %cst_138 = arith.constant 1.000000e+00 : f32
    %245 = vector.broadcast %cst_138 : f32 to vector<8x128xf32>
    %246 = arith.addf %245, %244 : vector<8x128xf32>
    %cst_139 = arith.constant 1.000000e+00 : f32
    %247 = vector.broadcast %cst_139 : f32 to vector<8x128xf32>
    %248 = arith.divf %247, %246 : vector<8x128xf32>
    %cst_140 = arith.constant 1.06140542 : f32
    %249 = vector.broadcast %cst_140 : f32 to vector<8x128xf32>
    %250 = arith.mulf %249, %248 : vector<8x128xf32>
    %cst_141 = arith.constant -1.45315206 : f32
    %251 = vector.broadcast %cst_141 : f32 to vector<8x128xf32>
    %252 = arith.addf %250, %251 : vector<8x128xf32>
    %253 = arith.mulf %252, %248 : vector<8x128xf32>
    %cst_142 = arith.constant 1.42141378 : f32
    %254 = vector.broadcast %cst_142 : f32 to vector<8x128xf32>
    %255 = arith.addf %253, %254 : vector<8x128xf32>
    %256 = arith.mulf %255, %248 : vector<8x128xf32>
    %cst_143 = arith.constant -0.284496725 : f32
    %257 = vector.broadcast %cst_143 : f32 to vector<8x128xf32>
    %258 = arith.addf %256, %257 : vector<8x128xf32>
    %259 = arith.mulf %258, %248 : vector<8x128xf32>
    %cst_144 = arith.constant 0.254829586 : f32
    %260 = vector.broadcast %cst_144 : f32 to vector<8x128xf32>
    %261 = arith.addf %259, %260 : vector<8x128xf32>
    %262 = arith.mulf %261, %248 : vector<8x128xf32>
    %cst_145 = arith.constant 0.000000e+00 : f32
    %263 = vector.broadcast %cst_145 : f32 to vector<8x128xf32>
    %264 = arith.subf %263, %242 : vector<8x128xf32>
    %265 = arith.mulf %264, %242 : vector<8x128xf32>
    %266 = math.exp %265 : vector<8x128xf32>
    %267 = arith.mulf %262, %266 : vector<8x128xf32>
    %cst_146 = arith.constant 1.000000e+00 : f32
    %268 = vector.broadcast %cst_146 : f32 to vector<8x128xf32>
    %269 = arith.subf %268, %267 : vector<8x128xf32>
    %cst_147 = arith.constant 0.000000e+00 : f32
    %270 = vector.broadcast %cst_147 : f32 to vector<8x128xf32>
    %271 = arith.cmpf oge, %241, %270 : vector<8x128xf32>
    %cst_148 = arith.constant 0.000000e+00 : f32
    %272 = vector.broadcast %cst_148 : f32 to vector<8x128xf32>
    %273 = arith.subf %272, %269 : vector<8x128xf32>
    %274 = arith.select %271, %269, %273 : vector<8x128xi1>, vector<8x128xf32>
    %cst_149 = arith.constant 1.000000e+00 : f32
    %275 = vector.broadcast %cst_149 : f32 to vector<8x128xf32>
    %276 = arith.addf %275, %274 : vector<8x128xf32>
    %277 = arith.mulf %239, %276 : vector<8x128xf32>
    %c0_150 = arith.constant 0 : index
    %c0_151 = arith.constant 0 : index
    %278 = vector.load %arg14[%c0_150, %c0_151] : memref<128x128xbf16, #tpu.memory_space<vmem>>, vector<128x128xbf16>
    %279 = arith.truncf %277 : vector<8x128xf32> to vector<8x128xbf16>
    %cst_152 = arith.constant dense<0.000000e+00> : vector<8x128xf32>
    %280 = tpu.matmul %279, %278, %cst_152 {dimension_numbers = #tpu.dot_dimension_numbers<[1], [0], [0], [1], [0, 0, 1, 1], [], []>} : vector<8x128xbf16>, vector<128x128xbf16>, vector<8x128xf32> -> vector<8x128xf32>
    %c0_153 = arith.constant 0 : index
    %c0_154 = arith.constant 0 : index
    %281 = vector.load %arg15[%c0_153, %c0_154] : memref<1x128xf32, #tpu.memory_space<vmem>>, vector<1x128xf32>
    %282 = vector.broadcast %281 : vector<1x128xf32> to vector<8x128xf32>
    %283 = arith.addf %280, %282 : vector<8x128xf32>
    %cst_155 = arith.constant 5.000000e-01 : f32
    %284 = vector.broadcast %cst_155 : f32 to vector<8x128xf32>
    %285 = arith.mulf %284, %283 : vector<8x128xf32>
    %cst_156 = arith.constant 0.707106769 : f32
    %286 = vector.broadcast %cst_156 : f32 to vector<8x128xf32>
    %287 = arith.mulf %283, %286 : vector<8x128xf32>
    %288 = math.absf %287 : vector<8x128xf32>
    %cst_157 = arith.constant 0.327591091 : f32
    %289 = vector.broadcast %cst_157 : f32 to vector<8x128xf32>
    %290 = arith.mulf %289, %288 : vector<8x128xf32>
    %cst_158 = arith.constant 1.000000e+00 : f32
    %291 = vector.broadcast %cst_158 : f32 to vector<8x128xf32>
    %292 = arith.addf %291, %290 : vector<8x128xf32>
    %cst_159 = arith.constant 1.000000e+00 : f32
    %293 = vector.broadcast %cst_159 : f32 to vector<8x128xf32>
    %294 = arith.divf %293, %292 : vector<8x128xf32>
    %cst_160 = arith.constant 1.06140542 : f32
    %295 = vector.broadcast %cst_160 : f32 to vector<8x128xf32>
    %296 = arith.mulf %295, %294 : vector<8x128xf32>
    %cst_161 = arith.constant -1.45315206 : f32
    %297 = vector.broadcast %cst_161 : f32 to vector<8x128xf32>
    %298 = arith.addf %296, %297 : vector<8x128xf32>
    %299 = arith.mulf %298, %294 : vector<8x128xf32>
    %cst_162 = arith.constant 1.42141378 : f32
    %300 = vector.broadcast %cst_162 : f32 to vector<8x128xf32>
    %301 = arith.addf %299, %300 : vector<8x128xf32>
    %302 = arith.mulf %301, %294 : vector<8x128xf32>
    %cst_163 = arith.constant -0.284496725 : f32
    %303 = vector.broadcast %cst_163 : f32 to vector<8x128xf32>
    %304 = arith.addf %302, %303 : vector<8x128xf32>
    %305 = arith.mulf %304, %294 : vector<8x128xf32>
    %cst_164 = arith.constant 0.254829586 : f32
    %306 = vector.broadcast %cst_164 : f32 to vector<8x128xf32>
    %307 = arith.addf %305, %306 : vector<8x128xf32>
    %308 = arith.mulf %307, %294 : vector<8x128xf32>
    %cst_165 = arith.constant 0.000000e+00 : f32
    %309 = vector.broadcast %cst_165 : f32 to vector<8x128xf32>
    %310 = arith.subf %309, %288 : vector<8x128xf32>
    %311 = arith.mulf %310, %288 : vector<8x128xf32>
    %312 = math.exp %311 : vector<8x128xf32>
    %313 = arith.mulf %308, %312 : vector<8x128xf32>
    %cst_166 = arith.constant 1.000000e+00 : f32
    %314 = vector.broadcast %cst_166 : f32 to vector<8x128xf32>
    %315 = arith.subf %314, %313 : vector<8x128xf32>
    %cst_167 = arith.constant 0.000000e+00 : f32
    %316 = vector.broadcast %cst_167 : f32 to vector<8x128xf32>
    %317 = arith.cmpf oge, %287, %316 : vector<8x128xf32>
    %cst_168 = arith.constant 0.000000e+00 : f32
    %318 = vector.broadcast %cst_168 : f32 to vector<8x128xf32>
    %319 = arith.subf %318, %315 : vector<8x128xf32>
    %320 = arith.select %317, %315, %319 : vector<8x128xi1>, vector<8x128xf32>
    %cst_169 = arith.constant 1.000000e+00 : f32
    %321 = vector.broadcast %cst_169 : f32 to vector<8x128xf32>
    %322 = arith.addf %321, %320 : vector<8x128xf32>
    %323 = arith.mulf %285, %322 : vector<8x128xf32>
    %324 = arith.addf %323, %208 : vector<8x128xf32>
    %325 = arith.addf %324, %1 : vector<8x128xf32>
    %c0_170 = arith.constant 0 : index
    %c0_171 = arith.constant 0 : index
    %c0_172 = arith.constant 0 : index
    %326 = vector.load %arg16[%c0_170, %c0_171, %c0_172] : memref<1x8x128xf32, #tpu.memory_space<vmem>>, vector<1x8x128xf32>
    %327 = vector.shape_cast %326 : vector<1x8x128xf32> to vector<8x128xf32>
    %328 = vector.shape_cast %325 : vector<8x128xf32> to vector<1x8x128xf32>
    tpu.vector_store %arg16[%c0_170, %c0_171, %c0_172], %328 {strides = array<i32>} : memref<1x8x128xf32, #tpu.memory_space<vmem>>, vector<1x8x128xf32>,
    return
  }
  func.func @transform_0(%arg0: i32) -> (i32, i32, i32) {
    %c0_i32 = arith.constant 0 : i32
    %c0_i32_0 = arith.constant 0 : i32
    %c0_i32_1 = arith.constant 0 : i32
    return %arg0, %c0_i32, %c0_i32_0 : i32, i32, i32
  }
  func.func @transform_1(%arg0: i32) -> (i32, i32) {
    %c0_i32 = arith.constant 0 : i32
    %c0_i32_0 = arith.constant 0 : i32
    %c0_i32_1 = arith.constant 0 : i32
    return %c0_i32, %c0_i32_0 : i32, i32
  }
  func.func @transform_2(%arg0: i32) -> (i32, i32) {
    %c0_i32 = arith.constant 0 : i32
    %c0_i32_0 = arith.constant 0 : i32
    %c0_i32_1 = arith.constant 0 : i32
    return %c0_i32, %c0_i32_0 : i32, i32
  }
  func.func @transform_3(%arg0: i32) -> (i32, i32, i32) {
    %c0_i32 = arith.constant 0 : i32
    %c0_i32_0 = arith.constant 0 : i32
    %c0_i32_1 = arith.constant 0 : i32
    %c0_i32_2 = arith.constant 0 : i32
    return %c0_i32, %c0_i32_0, %c0_i32_1 : i32, i32, i32
  }
  func.func @transform_4(%arg0: i32) -> (i32, i32, i32) {
    %c0_i32 = arith.constant 0 : i32
    %c0_i32_0 = arith.constant 0 : i32
    %c0_i32_1 = arith.constant 0 : i32
    %c0_i32_2 = arith.constant 0 : i32
    return %c0_i32, %c0_i32_0, %c0_i32_1 : i32, i32, i32
  }
  func.func @transform_5(%arg0: i32) -> (i32, i32, i32) {
    %c0_i32 = arith.constant 0 : i32
    %c0_i32_0 = arith.constant 0 : i32
    %c0_i32_1 = arith.constant 0 : i32
    %c0_i32_2 = arith.constant 0 : i32
    return %c0_i32, %c0_i32_0, %c0_i32_1 : i32, i32, i32
  }
  func.func @transform_6(%arg0: i32) -> (i32, i32, i32) {
    %c0_i32 = arith.constant 0 : i32
    %c0_i32_0 = arith.constant 0 : i32
    %c0_i32_1 = arith.constant 0 : i32
    %c0_i32_2 = arith.constant 0 : i32
    return %c0_i32, %c0_i32_0, %c0_i32_1 : i32, i32, i32
  }
  func.func @transform_7(%arg0: i32) -> (i32, i32, i32) {
    %c0_i32 = arith.constant 0 : i32
    %c0_i32_0 = arith.constant 0 : i32
    %c0_i32_1 = arith.constant 0 : i32
    %c0_i32_2 = arith.constant 0 : i32
    return %c0_i32, %c0_i32_0, %c0_i32_1 : i32, i32, i32
  }
  func.func @transform_8(%arg0: i32) -> (i32, i32, i32) {
    %c0_i32 = arith.constant 0 : i32
    %c0_i32_0 = arith.constant 0 : i32
    %c0_i32_1 = arith.constant 0 : i32
    %c0_i32_2 = arith.constant 0 : i32
    return %c0_i32, %c0_i32_0, %c0_i32_1 : i32, i32, i32
  }
  func.func @transform_9(%arg0: i32) -> (i32, i32, i32) {
    %c0_i32 = arith.constant 0 : i32
    %c0_i32_0 = arith.constant 0 : i32
    %c0_i32_1 = arith.constant 0 : i32
    %c0_i32_2 = arith.constant 0 : i32
    return %c0_i32, %c0_i32_0, %c0_i32_1 : i32, i32, i32
  }
  func.func @transform_10(%arg0: i32) -> (i32, i32) {
    %c0_i32 = arith.constant 0 : i32
    %c0_i32_0 = arith.constant 0 : i32
    %c0_i32_1 = arith.constant 0 : i32
    return %c0_i32, %c0_i32_0 : i32, i32
  }
  func.func @transform_11(%arg0: i32) -> (i32, i32) {
    %c0_i32 = arith.constant 0 : i32
    %c0_i32_0 = arith.constant 0 : i32
    %c0_i32_1 = arith.constant 0 : i32
    return %c0_i32, %c0_i32_0 : i32, i32
  }
  func.func @transform_12(%arg0: i32) -> (i32, i32) {
    %c0_i32 = arith.constant 0 : i32
    %c0_i32_0 = arith.constant 0 : i32
    %c0_i32_1 = arith.constant 0 : i32
    return %c0_i32, %c0_i32_0 : i32, i32
  }
  func.func @transform_13(%arg0: i32) -> (i32, i32) {
    %c0_i32 = arith.constant 0 : i32
    %c0_i32_0 = arith.constant 0 : i32
    %c0_i32_1 = arith.constant 0 : i32
    return %c0_i32, %c0_i32_0 : i32, i32
  }
  func.func @transform_14(%arg0: i32) -> (i32, i32) {
    %c0_i32 = arith.constant 0 : i32
    %c0_i32_0 = arith.constant 0 : i32
    %c0_i32_1 = arith.constant 0 : i32
    return %c0_i32, %c0_i32_0 : i32, i32
  }
  func.func @transform_15(%arg0: i32) -> (i32, i32, i32) {
    %c0_i32 = arith.constant 0 : i32
    %c0_i32_0 = arith.constant 0 : i32
    %c0_i32_1 = arith.constant 0 : i32
    return %arg0, %c0_i32, %c0_i32_0 : i32, i32, i32
  }
}

</mosaic_0001>

<bundles_post_ra>
// kernel: encoder_forward.1
= control target key start
LH: loop header
LB: loop body
LE: loop exit
PB: predicated region body
PF: predicated region fallthrough
CT: control target
= control target key end

     0   :  { %s4005_s18 = smov 0   ;;  %s4686_s0 = inlined_call_operand.vmem [shape: f32[2,8,128], index: 0, kind: input, shape index: {}]   ;;  %s4687_s1 = inlined_call_operand.vmem [shape: f32[1,128], index: 1, kind: input, shape index: {}]   ;;  %s4688_s2 = inlined_call_operand.vmem [shape: f32[1,128], index: 2, kind: input, shape index: {}]   ;;  %s4689_s3 = inlined_call_operand.vmem [shape: bf16[4,128,32], index: 3, kind: input, shape index: {}]   ;;  %s4690_s4 = inlined_call_operand.vmem [shape: f32[4,1,32], index: 4, kind: input, shape index: {}]   ;;  %s4691_s5 = inlined_call_operand.vmem [shape: bf16[4,128,32], index: 5, kind: input, shape index: {}]   ;;  %s4692_s6 = inlined_call_operand.vmem [shape: f32[4,1,32], index: 6, kind: input, shape index: {}]   ;;  %s4693_s7 = inlined_call_operand.vmem [shape: bf16[4,128,32], index: 7, kind: input, shape index: {}]   ;;  %s4694_s8 = inlined_call_operand.vmem [shape: f32[4,1,32], index: 8, kind: input, shape index: {}]   ;;  %s4695_s9 = inlined_call_operand.vmem [shape: bf16[4,32,128], index: 9, kind: input, shape index: {}]   ;;  %s4696_s10 = inlined_call_operand.vmem [shape: f32[1,128], index: 10, kind: input, shape index: {}]   ;;  %s4697_s11 = inlined_call_operand.vmem [shape: bf16[128,128], index: 11, kind: input, shape index: {}]   ;;  %s4698_s12 = inlined_call_operand.vmem [shape: f32[1,128], index: 12, kind: input, shape index: {}]   ;;  %s4699_s13 = inlined_call_operand.vmem [shape: bf16[128,128], index: 13, kind: input, shape index: {}]   ;;  %s4700_s14 = inlined_call_operand.vmem [shape: f32[1,128], index: 14, kind: input, shape index: {}]   ;;  %s4701_s15 = inlined_call_operand.vmem [shape: f32[2,8,128], index: 15, kind: output, shape index: {}]  }
   0x1 LB: > { %s2904_s19 = sadd.s32 4294967295, %s3921_s18   ;;  %p2908_p0 = scmp.ge.s32.totalorder %s3921_s18, 1  ;;  %s3921_s18 = sphi %s4005_s18, %s25_s18  }
   0x2   : > { %p436_p1 = scmp.lt.s32.totalorder %s3921_s18, 3 }
   0x4   : > { %p437_p2 = pnand %p2908_p0, %p436_p1 }
   0x5   : > { %p482_p3 = scmp.lt.s32.totalorder (!%p437_p2), %s2904_s19, 1  ;;  %v3764_v1 = vld [vmem:[%s4689_s3] sm:$0xff] (!%p437_p2)   ;;  %v3923_v3 = vmov (!%p437_p2), 0.0   ;;  %v3766_v4 = vld [vmem:[%s4689_s3 + $0x8] sm:$0xff] (!%p437_p2)   ;;  %v3768_v6 = vld [vmem:[%s4689_s3 + $0x10] sm:$0xff] (!%p437_p2)   ;;  %vm3924_vm0 = vmmov (!%p437_p2), 0  }
   0x6   : > { %440 = sbr.rel (%p437_p2) target bundleno = 5342 (0x14de), region = 80  ;;  %v3765_v2 = vld [vmem:[%s4691_s5] sm:$0xff] (!%p437_p2)   ;;  %3381 = vmatprep.subr.bf16.mxu0 (!%p437_p2), %v3923_v3  ;;  %3401 = vmatprep.subr.bf16.mxu1 (!%p437_p2), %v3923_v3  ;;  %v3767_v5 = vld [vmem:[%s4691_s5 + $0x8] sm:$0xff] (!%p437_p2)   ;;  %v3769_v11 = vld [vmem:[%s4691_s5 + $0x10] sm:$0xff] (!%p437_p2)   ;;  %vm863_vm1 = vcmask (!%p437_p2), 261120   ;;  %vm927_vm2 = vcmask (!%p437_p2), 1043456  }
   0x7   : > { %3382 = vmatpush3.bf16.msra.mxu0 (!%p437_p2), %v3764_v1  ;;  %3402 = vmatpush3.bf16.msra.mxu1 (!%p437_p2), %v3765_v2  ;;  %v3770_v12 = vld [vmem:[%s4689_s3 + $0x18] sm:$0xff] (!%p437_p2)   ;;  %v3772_v14 = vld [vmem:[%s4689_s3 + $0x20] sm:$0xff] (!%p437_p2)   ;;  %v3774_v16 = vld [vmem:[%s4689_s3 + $0x28] sm:$0xff] (!%p437_p2)   ;;  %vm910_vm3 = vcmask (!%p437_p2), 64512  }
   0x8   : > { %3383 = vmatprep.subr.bf16.mxu0 (!%p437_p2), %v3923_v3  ;;  %3403 = vmatprep.subr.bf16.mxu1 (!%p437_p2), %v3923_v3  ;;  %v3771_v13 = vld [vmem:[%s4691_s5 + $0x18] sm:$0xff] (!%p437_p2)   ;;  %v3773_v15 = vld [vmem:[%s4691_s5 + $0x20] sm:$0xff] (!%p437_p2)   ;;  %v3775_v17 = vld [vmem:[%s4691_s5 + $0x28] sm:$0xff] (!%p437_p2)  }
   0x9   : > { %v3776_v18 = vld [vmem:[%s4689_s3 + $0x30] sm:$0xff] (!%p437_p2)   ;;  %v3778_v20 = vld [vmem:[%s4689_s3 + $0x38] sm:$0xff] (!%p437_p2)   ;;  %3397 = vmatprep.mubr.msk.bf16.mxu0 (!%p437_p2), %vm3924_vm0, %v3923_v3  ;;  %3417 = vmatprep.mubr.msk.bf16.mxu1 (!%p437_p2), %vm3924_vm0, %v3923_v3  ;;  %v2911_v26 = vld [vmem:[%s4687_s1] ss:$0 sm:$0xff] (!%p437_p2) }
   0xa   : > { %v3777_v19 = vld [vmem:[%s4691_s5 + $0x30] sm:$0xff] (!%p437_p2)   ;;  %v3779_v21 = vld [vmem:[%s4691_s5 + $0x38] sm:$0xff] (!%p437_p2)   ;;  %v2912_v28 = vld [vmem:[%s4688_s2] ss:$0 sm:$0xff] (!%p437_p2) }
   0xb   : > { %3384 = vmatpush3.bf16.msra.mxu0 (!%p437_p2), %v3766_v4  ;;  %3404 = vmatpush3.bf16.msra.mxu1 (!%p437_p2), %v3767_v5  ;;  %v3780_v31 = vld [vmem:[%s4693_s7] sm:$0xff] (!%p437_p2)   ;;  %v3781_v33 = vld [vmem:[%s4693_s7 + $0x8] sm:$0xff] (!%p437_p2)   ;;  %v3782_v34 = vld [vmem:[%s4693_s7 + $0x10] sm:$0xff] (!%p437_p2)  }
   0xc   : > { %3385 = vmatprep.subr.bf16.mxu0 (!%p437_p2), %v3923_v3  ;;  %3405 = vmatprep.subr.bf16.mxu1 (!%p437_p2), %v3923_v3  ;;  %v3783_v35 = vld [vmem:[%s4693_s7 + $0x18] sm:$0xff] (!%p437_p2)   ;;  %v3784_v36 = vld [vmem:[%s4693_s7 + $0x20] sm:$0xff] (!%p437_p2)   ;;  %v3785_v37 = vld [vmem:[%s4693_s7 + $0x28] sm:$0xff] (!%p437_p2)  }
   0xd   : > { %s4703_s19 = smov (!%p482_p3, %s2904_s19), 1  ;;  %v3786_v38 = vld [vmem:[%s4693_s7 + $0x30] sm:$0xff]   ;;  %v3787_v39 = vld [vmem:[%s4693_s7 + $0x38] sm:$0xff]   ;;  %v3788_v40 = vld [vmem:[%s4691_s5 + $0x40] sm:$0xff]  }
   0xe   : > { %s2909_s20 = sshll.u32 %s4703_s19, 3  ;;  %v3789_v41 = vld [vmem:[%s4691_s5 + $0x48] sm:$0xff]   ;;  %v3790_v42 = vld [vmem:[%s4691_s5 + $0x50] sm:$0xff]   ;;  %v3791_v43 = vld [vmem:[%s4691_s5 + $0x58] sm:$0xff]  }
   0xf   : > { %s4021_s23 = scalar_lea.vmem %s4686_s0, %s2909_s20  ;;  %3386 = vmatpush3.bf16.msra.mxu0 %v3768_v6  ;;  %3406 = vmatpush3.bf16.msra.mxu1 %v3769_v11  ;;  %v3792_v44 = vld [vmem:[%s4691_s5 + $0x60] sm:$0xff]   ;;  %v3793_v45 = vld [vmem:[%s4691_s5 + $0x68] sm:$0xff]   ;;  %v3794_v46 = vld [vmem:[%s4691_s5 + $0x70] sm:$0xff]   ;;  %s489_s25 = scalar_lea.vmem %s4701_s15, %s2909_s20 }
  0x10   : > { %v491_v0 = vld [vmem:[%s4021_s23] sm:$0xff]  ;;  %3387 = vmatprep.subr.bf16.mxu0 %v3923_v3  ;;  %3407 = vmatprep.subr.bf16.mxu1 %v3923_v3  ;;  %v3795_v47 = vld [vmem:[%s4691_s5 + $0x78] sm:$0xff]  }
  0x11   : > { %494 = vadd.xlane.f32.xlu0 %v491_v0  ;;  %v2923_v48 = vld [vmem:[%s4692_s6] ss:$0 sm:$0xff] }
  0x12   : > { %v2914_v59 = vld [vmem:[%s4690_s4] ss:$0 sm:$0xff] }
  0x13   : > { %3388 = vmatpush3.bf16.msra.mxu0 %v3770_v12  ;;  %3408 = vmatpush3.bf16.msra.mxu1 %v3771_v13  ;;  %v2932_v63 = vld [vmem:[%s4694_s8] ss:$0 sm:$0xff] }
  0x14   : > { %3389 = vmatprep.subr.bf16.mxu0 %v3923_v3  ;;  %3409 = vmatprep.subr.bf16.mxu1 %v3923_v3 }
  0x17   : > { %3390 = vmatpush3.bf16.msra.mxu0 %v3772_v14  ;;  %3410 = vmatpush3.bf16.msra.mxu1 %v3773_v15 }
  0x18   : > { %3391 = vmatprep.subr.bf16.mxu0 %v3923_v3  ;;  %3411 = vmatprep.subr.bf16.mxu1 %v3923_v3 }
  0x1b   : > { %3392 = vmatpush3.bf16.msra.mxu0 %v3774_v16  ;;  %3412 = vmatpush3.bf16.msra.mxu1 %v3775_v17 }
  0x1c   : > { %3393 = vmatprep.subr.bf16.mxu0 %v3923_v3  ;;  %3413 = vmatprep.subr.bf16.mxu1 %v3923_v3 }
  0x1f   : > { %3394 = vmatpush3.bf16.msra.mxu0 %v3776_v18  ;;  %3414 = vmatpush3.bf16.msra.mxu1 %v3777_v19 }
  0x20   : > { %3395 = vmatprep.subr.bf16.mxu0 %v3923_v3  ;;  %3415 = vmatprep.subr.bf16.mxu1 %v3923_v3 }
  0x23   : > { %3396 = vmatpush3.bf16.msra.mxu0 %v3778_v20  ;;  %3416 = vmatpush3.bf16.msra.mxu1 %v3779_v21 }
  0x24   : > { %3421 = vmatprep.subr.bf16.mxu0 %v3923_v3  ;;  %3441 = vmatprep.subr.bf16.mxu1 %v3923_v3 }
  0x9e   : > { %v495_v7 = vpop.xlane.xlu0 %494 }
  0x9f   : > { %v497_v8 = vmul.f32 0.0078125, %v495_v7 }
  0xa1   : > { %v498_v9 = vsub.f32 %v491_v0, %v497_v8  ;;  %v2989_v8 = vld [vmem:[%s4692_s6 + $0x1] ss:$0 sm:$0xff] }
  0xa3   : > { %v499_v10 = vmul.f32 %v498_v9, %v498_v9 }
  0xa5   : > { %500 = vadd.xlane.f32.xlu0 %v499_v10 }
 0x132   : > { %v501_v22 = vpop.xlane.xlu0 %500 }
 0x133   : > { %v502_v23 = vmul.f32 0.0078125, %v501_v22 }
 0x135   : > { %v503_v24 = vadd.f32 1e-05, %v502_v23 }
 0x137   : > { %3884 = vrsqrt.f32 %v503_v24 }
 0x141   : > { %v3885_v25 = vpop.eup %3884 }
 0x142   : > { %v505_v27 = vmul.f32 %v3885_v25, %v498_v9 }
 0x144   : > { %v512_v29 = vmul.f32 %v2911_v26, %v505_v27 }
 0x146   : > { %v519_v30 = vadd.f32 %v2912_v28, %v512_v29  ;;  %v3796_v29 = vld [vmem:[%s4695_s9] sm:$0xff]  }
 0x148   : > { %v4103_v32 = vpack.c.bf16 %v519_v30, %v519_v30 }
 0x14a   : > { %3398 = vmatmul.mubr.bf16.vlgmr.msra.gmra.mrb[0].mxu0 %v4103_v32  ;;  %3418 = vmatmul.mubr.bf16.vlgmr.msra.gmra.mrb[0].mxu1 %v4103_v32 }
 0x14b   : > { %3422 = vmatpush3.bf16.msra.mxu0 %v3780_v31  ;;  %3437 = vmatprep.mubr.msk.bf16.mxu0 %vm3924_vm0, %v3923_v3  ;;  %v3797_v31 = vld [vmem:[%s4695_s9 + $0x8] sm:$0xff]  }
 0x14c   : > { %3423 = vmatprep.subr.bf16.mxu0 %v3923_v3  ;;  %3443 = vmatprep.mubr.msk.bf16.mxu1 %vm3924_vm0, %v3923_v3 }
 0x14f   : > { %3424 = vmatpush3.bf16.msra.mxu0 %v3781_v33 }
 0x150   : > { %3425 = vmatprep.subr.bf16.mxu0 %v3923_v3 }
 0x153   : > { %3426 = vmatpush3.bf16.msra.mxu0 %v3782_v34  ;;  %v3798_v34 = vld [vmem:[%s4689_s3 + $0x40] sm:$0xff]  }
 0x154   : > { %3427 = vmatprep.subr.bf16.mxu0 %v3923_v3 }
 0x157   : > { %3428 = vmatpush3.bf16.msra.mxu0 %v3783_v35 }
 0x158   : > { %3429 = vmatprep.subr.bf16.mxu0 %v3923_v3 }
 0x15b   : > { %3430 = vmatpush3.bf16.msra.mxu0 %v3784_v36 }
 0x15c   : > { %3431 = vmatprep.subr.bf16.mxu0 %v3923_v3 }
 0x15f   : > { %3432 = vmatpush3.bf16.msra.mxu0 %v3785_v37 }
 0x160   : > { %3433 = vmatprep.subr.bf16.mxu0 %v3923_v3 }
 0x163   : > { %3434 = vmatpush3.bf16.msra.mxu0 %v3786_v38 }
 0x164   : > { %3435 = vmatprep.subr.bf16.mxu0 %v3923_v3 }
 0x167   : > { %3436 = vmatpush3.bf16.msra.mxu0 %v3787_v39  ;;  %v3799_v39 = vld [vmem:[%s4689_s3 + $0x48] sm:$0xff]  }
 0x168   : > { %3481 = vmatprep.subr.bf16.mxu0 %v3923_v3 }
 0x16a   : > { %3438 = vmatmul.mubr.bf16.vlgmr.msra.gmra.mrb[4].mxu0 %v4103_v32 }
 0x16b   : > { %3482 = vmatpush3.bf16.msra.mxu0 %v3788_v40  ;;  %3497 = vmatprep.mubr.msk.bf16.mxu0 %vm3924_vm0, %v3923_v3  ;;  %v3800_v40 = vld [vmem:[%s4689_s3 + $0x50] sm:$0xff]  }
 0x16c   : > { %3483 = vmatprep.subr.bf16.mxu0 %v3923_v3 }
 0x16f   : > { %3484 = vmatpush3.bf16.msra.mxu0 %v3789_v41  ;;  %v3801_v41 = vld [vmem:[%s4689_s3 + $0x58] sm:$0xff]  }
 0x170   : > { %3485 = vmatprep.subr.bf16.mxu0 %v3923_v3 }
 0x173   : > { %3486 = vmatpush3.bf16.msra.mxu0 %v3790_v42  ;;  %v3802_v42 = vld [vmem:[%s4689_s3 + $0x60] sm:$0xff]  }
 0x174   : > { %3487 = vmatprep.subr.bf16.mxu0 %v3923_v3 }
 0x177   : > { %3488 = vmatpush3.bf16.msra.mxu0 %v3791_v43  ;;  %v3803_v43 = vld [vmem:[%s4689_s3 + $0x68] sm:$0xff]  }
 0x178   : > { %3489 = vmatprep.subr.bf16.mxu0 %v3923_v3 }
 0x17b   : > { %3490 = vmatpush3.bf16.msra.mxu0 %v3792_v44  ;;  %v3804_v44 = vld [vmem:[%s4689_s3 + $0x70] sm:$0xff]  }
 0x17c   : > { %3491 = vmatprep.subr.bf16.mxu0 %v3923_v3 }
 0x17f   : > { %3492 = vmatpush3.bf16.msra.mxu0 %v3793_v45  ;;  %v3805_v45 = vld [vmem:[%s4689_s3 + $0x78] sm:$0xff]  }
 0x180   : > { %3493 = vmatprep.subr.bf16.mxu0 %v3923_v3 }
 0x183   : > { %3494 = vmatpush3.bf16.msra.mxu0 %v3794_v46  ;;  %v3806_v46 = vld [vmem:[%s4693_s7 + $0x40] sm:$0xff]  }
 0x184   : > { %3495 = vmatprep.subr.bf16.mxu0 %v3923_v3 }
 0x187   : > { %3496 = vmatpush3.bf16.msra.mxu0 %v3795_v47  ;;  %v3807_v47 = vld [vmem:[%s4693_s7 + $0x48] sm:$0xff]  }
 0x188   : > { %3521 = vmatprep.subr.bf16.mxu0 %v3923_v3 }
 0x18a   : > { %3498 = vmatmul.mubr.bf16.vlgmr.msra.gmra.mrb[8].mxu0 %v4103_v32 }
 0x18b   : > { %3523 = vmatprep.mubr.msk.bf16.mxu0 %vm3924_vm0, %v3923_v3 }
 0x21d   : > { %v633_v49 = vpop.f32.mrb[0].mxu0  ;;  %v744_v50 = vpop.f32.mrb[0].mxu1 }
 0x21e   : > { %v745_v51 = vadd.f32 %v2923_v48, %v744_v50  ;;  %v3399_v52 = vpop.f32.mrb[1].mxu0  ;;  %v3419_v53 = vpop.f32.mrb[1].mxu1  ;;  %v634_v61 = vadd.f32 %v2914_v59, %v633_v49  ;;  %v3808_v48 = vld [vmem:[%s4693_s7 + $0x50] sm:$0xff]   ;;  %v3809_v49 = vld [vmem:[%s4693_s7 + $0x58] sm:$0xff]   ;;  %v3810_v50 = vld [vmem:[%s4693_s7 + $0x60] sm:$0xff]  }
 0x21f   : > { %v636_v54 = vpop.f32.mrb[2].mxu0  ;;  %v747_v55 = vpop.f32.mrb[2].mxu1  ;;  %v3812_v52 = vld [vmem:[%s4693_s7 + $0x70] sm:$0xff]   ;;  %v3813_v53 = vld [vmem:[%s4693_s7 + $0x78] sm:$0xff]  }
 0x220   : > { %v862_v56 = vpack.c.bf16 %v745_v51, %v745_v51  ;;  %v3400_v57 = vpop.f32.mrb[3].mxu0  ;;  %v3420_v58 = vpop.f32.mrb[3].mxu1  ;;  %v861_v62 = vpack.c.bf16 %v634_v61, %v634_v61  ;;  %v3811_v51 = vld [vmem:[%s4693_s7 + $0x68] sm:$0xff]   ;;  %v2963_v54 = vld [vmem:[%s4690_s4 + $0x1] ss:$0 sm:$0xff] }
 0x221   : > { %v3015_v61 = vld [vmem:[%s4694_s8 + $0x1] ss:$0 sm:$0xff] }
 0x222   : > { %v868_v60 = vsel %vm863_vm1, %v862_v56, 0 }
 0x223   : > { %3442 = vmatpush3.bf16.xpose.msra.mxu1 %v868_v60 }
 0x224   : > { %3447 = vmatprep.subr.bf16.mxu1 %v3923_v3 }
 0x22a   : > { %3444 = vmatmul.mubr.msk.bf16.vlgmr.msra.gmra.mrb[4].mxu1 %vm863_vm1, %v861_v62 }
 0x22b   : > { %3449 = vmatprep.mubr.msk.bf16.mxu1 %vm3924_vm0, %v3923_v3 }
 0x23d   : > { %v855_v0 = vpop.f32.mrb[4].mxu0 }
 0x23e   : > { %v856_v1 = vadd.f32 %v2932_v63, %v855_v0  ;;  %v3439_v2 = vpop.f32.mrb[5].mxu0 }
 0x23f   : > { %v858_v4 = vpop.f32.mrb[6].mxu0 }
 0x240   : > { %v923_v5 = vpack.c.bf16 %v856_v1, %v856_v1  ;;  %v3440_v6 = vpop.f32.mrb[7].mxu0 }
 0x242   : > { %v929_v7 = vsel %vm927_vm2, %v923_v5, 0 }
 0x243   : > { %3448 = vmatpush3.bf16.msra.mxu1 %v929_v7 }
 0x244   : > { %3453 = vmatprep.subr.bf16.mxu1 %v3923_v3 }
 0x25d   : > { %v1252_v9 = vpop.f32.mrb[8].mxu0 }
 0x25e   : > { %v1253_v10 = vadd.f32 %v2989_v8, %v1252_v9  ;;  %v3499_v11 = vpop.f32.mrb[9].mxu0 }
 0x25f   : > { %v1255_v12 = vpop.f32.mrb[10].mxu0 }
 0x260   : > { %v1372_v13 = vpack.c.bf16 %v1253_v10, %v1253_v10  ;;  %v3500_v14 = vpop.f32.mrb[11].mxu0 }
 0x262   : > { %v1377_v15 = vsel %vm863_vm1, %v1372_v13, 0 }
 0x263   : > { %3522 = vmatpush3.bf16.xpose.msra.mxu0 %v1377_v15 }
 0x264   : > { %3527 = vmatprep.subr.bf16.mxu0 %v3923_v3 }
 0x2fd   : > { %v904_v16 = vpop.f32.mrb[4].mxu1 }
 0x2fe   : > { %v3445_v17 = vpop.f32.mrb[5].mxu1  ;;  %v911_v18 = vsel %vm910_vm3, %v904_v16, -inf }
 0x2ff   : > { %912 = vmax.xlane.f32.xlu1 %v911_v18  ;;  %v907_v19 = vpop.f32.mrb[6].mxu1 }
 0x300   : > { %v3446_v20 = vpop.f32.mrb[7].mxu1  ;;  %v3814_v19 = vld [vmem:[%s4689_s3 + $0x80] sm:$0xff]  }
 0x38c   : > { %v913_v21 = vpop.xlane.xlu1 %912 }
 0x38d   : > { %v914_v22 = vsub.f32 %v904_v16, %v913_v21  ;;  %v3846_v21 = vld [vmem:[%s4695_s9 + $0x10] sm:$0xff]  }
 0x38f   : > { %v915_v23 = vmul.f32 1.442695, %v914_v22  ;;  %v3815_v22 = vld [vmem:[%s4689_s3 + $0x88] sm:$0xff]  }
 0x391   : > { %3886 = vpow2.f32 %v915_v23  ;;  %v3847_v23 = vld [vmem:[%s4695_s9 + $0x18] sm:$0xff]  }
 0x39b   : > { %v3887_v24 = vpop.eup %3886 }
 0x39c   : > { %v917_v25 = vsel %vm910_vm3, %v3887_v24, 0.0 }
 0x39d   : > { %918 = vadd.xlane.f32.xlu1 %v917_v25  ;;  %v3817_v25 = vld [vmem:[%s4689_s3 + $0x98] sm:$0xff]  }
 0x42a   : > { %v919_v26 = vpop.xlane.xlu1 %918 }
 0x42b   : > { %3888 = vrcp.f32 %v919_v26  ;;  %v3818_v26 = vld [vmem:[%s4689_s3 + $0xa0] sm:$0xff]  }
 0x435   : > { %v3889_v27 = vpop.eup %3888 }
 0x436   : > { %v921_v28 = vmul.f32 %v3889_v27, %v3887_v24  ;;  %v3816_v24 = vld [vmem:[%s4689_s3 + $0x90] sm:$0xff]   ;;  %v3819_v27 = vld [vmem:[%s4689_s3 + $0xa8] sm:$0xff]  }
 0x438   : > { %v922_v30 = vpack.c.bf16 %v921_v28, %v921_v28  ;;  %v3820_v28 = vld [vmem:[%s4689_s3 + $0xb0] sm:$0xff]  }
 0x43a   : > { %3450 = vmatmul.mubr.msk.bf16.vlgmr.msra.gmra.mrb[8].mxu1 %vm910_vm3, %v922_v30  ;;  %v3822_v30 = vld [vmem:[%s4693_s7 + $0x80] sm:$0xff]  }
 0x43b   : > { %3454 = vmatpush3.bf16.msra.mxu1 %v3796_v29  ;;  %3457 = vmatprep.mubr.msk.bf16.mxu1 %vm3924_vm0, %v3923_v3  ;;  %v3821_v29 = vld [vmem:[%s4689_s3 + $0xb8] sm:$0xff]  }
 0x43c   : > { %3455 = vmatprep.subr.bf16.mxu1 %v3923_v3 }
 0x43f   : > { %3456 = vmatpush3.bf16.msra.mxu1 %v3797_v31  ;;  %v3823_v31 = vld [vmem:[%s4693_s7 + $0x88] sm:$0xff]  }
 0x440   : > { %3461 = vmatprep.subr.bf16.mxu1 %v3923_v3 }
 0x50d   : > { %v965_v33 = vpop.f32.mrb[8].mxu1 }
 0x50e   : > { %v975_v35 = vpack.c.bf16 %v965_v33, %v965_v33  ;;  %v3451_v36 = vpop.f32.mrb[9].mxu1  ;;  %v3824_v33 = vld [vmem:[%s4693_s7 + $0x90] sm:$0xff]  }
 0x50f   : > { %v968_v37 = vpop.f32.mrb[10].mxu1  ;;  %v3827_v36 = vld [vmem:[%s4693_s7 + $0xa8] sm:$0xff]  }
 0x510   : > { %v3452_v38 = vpop.f32.mrb[11].mxu1  ;;  %3458 = vmatmul.mubr.msk.bf16.vlgmr.msra.gmra.mrb[12].mxu1 %vm863_vm1, %v975_v35  ;;  %v3826_v35 = vld [vmem:[%s4693_s7 + $0xa0] sm:$0xff]   ;;  %v3828_v37 = vld [vmem:[%s4693_s7 + $0xb0] sm:$0xff]  }
 0x511   : > { %3462 = vmatpush3.bf16.msra.mxu1 %v3798_v34  ;;  %3477 = vmatprep.mubr.msk.bf16.mxu1 %vm3924_vm0, %v3923_v3  ;;  %v3825_v34 = vld [vmem:[%s4693_s7 + $0x98] sm:$0xff]  }
 0x512   : > { %3463 = vmatprep.subr.bf16.mxu1 %v3923_v3  ;;  %v3829_v38 = vld [vmem:[%s4693_s7 + $0xb8] sm:$0xff]  }
 0x515   : > { %3464 = vmatpush3.bf16.msra.mxu1 %v3799_v39  ;;  %v3830_v39 = vld [vmem:[%s4689_s3 + $0xc0] sm:$0xff]  }
 0x516   : > { %3465 = vmatprep.subr.bf16.mxu1 %v3923_v3 }
 0x519   : > { %3466 = vmatpush3.bf16.msra.mxu1 %v3800_v40  ;;  %v3831_v40 = vld [vmem:[%s4689_s3 + $0xc8] sm:$0xff]  }
 0x51a   : > { %3467 = vmatprep.subr.bf16.mxu1 %v3923_v3 }
 0x51d   : > { %3468 = vmatpush3.bf16.msra.mxu1 %v3801_v41  ;;  %v3832_v41 = vld [vmem:[%s4689_s3 + $0xd0] sm:$0xff]  }
 0x51e   : > { %3469 = vmatprep.subr.bf16.mxu1 %v3923_v3 }
 0x521   : > { %3470 = vmatpush3.bf16.msra.mxu1 %v3802_v42  ;;  %v3833_v42 = vld [vmem:[%s4689_s3 + $0xd8] sm:$0xff]  }
 0x522   : > { %3471 = vmatprep.subr.bf16.mxu1 %v3923_v3 }
 0x525   : > { %3472 = vmatpush3.bf16.msra.mxu1 %v3803_v43  ;;  %v3834_v43 = vld [vmem:[%s4689_s3 + $0xe0] sm:$0xff]  }
 0x526   : > { %3473 = vmatprep.subr.bf16.mxu1 %v3923_v3 }
 0x529   : > { %3474 = vmatpush3.bf16.msra.mxu1 %v3804_v44  ;;  %v3835_v44 = vld [vmem:[%s4689_s3 + $0xe8] sm:$0xff]  }
 0x52a   : > { %3475 = vmatprep.subr.bf16.mxu1 %v3923_v3 }
 0x52d   : > { %3476 = vmatpush3.bf16.msra.mxu1 %v3805_v45  ;;  %v3836_v45 = vld [vmem:[%s4689_s3 + $0xf0] sm:$0xff]  }
 0x52e   : > { %3501 = vmatprep.subr.bf16.mxu1 %v3923_v3 }
 0x530   : > { %3478 = vmatmul.mubr.bf16.vlgmr.msra.gmra.mrb[16].mxu1 %v4103_v32 }
 0x531   : > { %3502 = vmatpush3.bf16.msra.mxu1 %v3806_v46  ;;  %3517 = vmatprep.mubr.msk.bf16.mxu1 %vm3924_vm0, %v3923_v3  ;;  %v3837_v46 = vld [vmem:[%s4689_s3 + $0xf8] sm:$0xff]  }
 0x532   : > { %3503 = vmatprep.subr.bf16.mxu1 %v3923_v3 }
 0x535   : > { %3504 = vmatpush3.bf16.msra.mxu1 %v3807_v47  ;;  %v3838_v47 = vld [vmem:[%s4693_s7 + $0xc0] sm:$0xff]  }
 0x536   : > { %3505 = vmatprep.subr.bf16.mxu1 %v3923_v3 }
 0x539   : > { %3506 = vmatpush3.bf16.msra.mxu1 %v3808_v48  ;;  %v3839_v48 = vld [vmem:[%s4693_s7 + $0xc8] sm:$0xff]  }
 0x53a   : > { %3507 = vmatprep.subr.bf16.mxu1 %v3923_v3 }
 0x53d   : > { %3508 = vmatpush3.bf16.msra.mxu1 %v3809_v49  ;;  %v3840_v49 = vld [vmem:[%s4693_s7 + $0xd0] sm:$0xff]  }
 0x53e   : > { %3509 = vmatprep.subr.bf16.mxu1 %v3923_v3 }
 0x541   : > { %3510 = vmatpush3.bf16.msra.mxu1 %v3810_v50  ;;  %v3841_v50 = vld [vmem:[%s4693_s7 + $0xd8] sm:$0xff]  }
 0x542   : > { %3511 = vmatprep.subr.bf16.mxu1 %v3923_v3 }
 0x545   : > { %3512 = vmatpush3.bf16.msra.mxu1 %v3811_v51  ;;  %v3842_v51 = vld [vmem:[%s4693_s7 + $0xe0] sm:$0xff]  }
 0x546   : > { %3513 = vmatprep.subr.bf16.mxu1 %v3923_v3 }
 0x549   : > { %3514 = vmatpush3.bf16.msra.mxu1 %v3812_v52  ;;  %v3843_v52 = vld [vmem:[%s4693_s7 + $0xe8] sm:$0xff]  }
 0x54a   : > { %3515 = vmatprep.subr.bf16.mxu1 %v3923_v3 }
 0x54d   : > { %3516 = vmatpush3.bf16.msra.mxu1 %v3813_v53  ;;  %v3844_v53 = vld [vmem:[%s4693_s7 + $0xf0] sm:$0xff]  }
 0x54e   : > { %3533 = vmatprep.subr.bf16.mxu1 %v3923_v3 }
 0x550   : > { %3518 = vmatmul.mubr.bf16.vlgmr.msra.gmra.mrb[20].mxu1 %v4103_v32 }
 0x551   : > { %3537 = vmatprep.mubr.msk.bf16.mxu1 %vm3924_vm0, %v3923_v3  ;;  %3534 = vmatpush3.bf16.msra.mxu1 %v3846_v21  ;;  %v3076_v21 = vld [vmem:[%s4692_s6 + $0x2] ss:$0 sm:$0xff] }
 0x552   : > { %3535 = vmatprep.subr.bf16.mxu1 %v3923_v3 }
 0x555   : > { %3536 = vmatpush3.bf16.msra.mxu1 %v3847_v23 }
 0x556   : > { %3561 = vmatprep.subr.bf16.mxu1 %v3923_v3 }
 0x603   : > { %v1139_v55 = vpop.f32.mrb[16].mxu1 }
 0x604   : > { %v1140_v56 = vadd.f32 %v2963_v54, %v1139_v55  ;;  %v3479_v57 = vpop.f32.mrb[17].mxu1  ;;  %v3845_v54 = vld [vmem:[%s4693_s7 + $0xf8] sm:$0xff]  }
 0x605   : > { %v1142_v58 = vpop.f32.mrb[18].mxu1 }
 0x606   : > { %v1371_v59 = vpack.c.bf16 %v1140_v56, %v1140_v56  ;;  %v3480_v60 = vpop.f32.mrb[19].mxu1  ;;  %v3848_v56 = vld [vmem:[%s4691_s5 + $0x80] sm:$0xff]  }
 0x608   : > { %3524 = vmatmul.mubr.msk.bf16.vlgmr.msra.gmra.mrb[12].mxu0 %vm863_vm1, %v1371_v59 }
 0x609   : > { %3529 = vmatprep.mubr.msk.bf16.mxu0 %vm3924_vm0, %v3923_v3 }
 0x623   : > { %v1365_v62 = vpop.f32.mrb[20].mxu1 }
 0x624   : > { %v1366_v63 = vadd.f32 %v3015_v61, %v1365_v62  ;;  %v3519_v0 = vpop.f32.mrb[21].mxu1  ;;  %v3849_v61 = vld [vmem:[%s4691_s5 + $0x88] sm:$0xff]   ;;  %v3850_v62 = vld [vmem:[%s4691_s5 + $0x90] sm:$0xff]  }
 0x625   : > { %v1368_v1 = vpop.f32.mrb[22].mxu1  ;;  %v3852_v0 = vld [vmem:[%s4691_s5 + $0xa0] sm:$0xff]  }
 0x626   : > { %v1431_v2 = vpack.c.bf16 %v1366_v63, %v1366_v63  ;;  %v3520_v4 = vpop.f32.mrb[23].mxu1  ;;  %v3851_v63 = vld [vmem:[%s4691_s5 + $0x98] sm:$0xff]   ;;  %v3853_v1 = vld [vmem:[%s4691_s5 + $0xa8] sm:$0xff]  }
 0x627   : > { %v3855_v4 = vld [vmem:[%s4691_s5 + $0xb8] sm:$0xff]  }
 0x628   : > { %v1436_v5 = vsel %vm927_vm2, %v1431_v2, 0  ;;  %v3854_v2 = vld [vmem:[%s4691_s5 + $0xb0] sm:$0xff]  }
 0x629   : > { %3528 = vmatpush3.bf16.msra.mxu0 %v1436_v5 }
 0x62a   : > { %3541 = vmatprep.subr.bf16.mxu0 %v3923_v3 }
 0x6db   : > { %v1413_v6 = vpop.f32.mrb[12].mxu0 }
 0x6dc   : > { %v3525_v7 = vpop.f32.mrb[13].mxu0  ;;  %v1419_v8 = vsel %vm910_vm3, %v1413_v6, -inf }
 0x6dd   : > { %1420 = vmax.xlane.f32.xlu0 %v1419_v8  ;;  %v1416_v9 = vpop.f32.mrb[14].mxu0 }
 0x6de   : > { %v3526_v10 = vpop.f32.mrb[15].mxu0 }
 0x76a   : > { %v1421_v11 = vpop.xlane.xlu0 %1420 }
 0x76b   : > { %v1422_v12 = vsub.f32 %v1413_v6, %v1421_v11 }
 0x76d   : > { %v1423_v13 = vmul.f32 1.442695, %v1422_v12 }
 0x76f   : > { %3890 = vpow2.f32 %v1423_v13 }
 0x779   : > { %v3891_v14 = vpop.eup %3890 }
 0x77a   : > { %v1425_v15 = vsel %vm910_vm3, %v3891_v14, 0.0 }
 0x77b   : > { %1426 = vadd.xlane.f32.xlu1 %v1425_v15 }
 0x808   : > { %v1427_v16 = vpop.xlane.xlu1 %1426 }
 0x809   : > { %3892 = vrcp.f32 %v1427_v16 }
 0x813   : > { %v3893_v17 = vpop.eup %3892 }
 0x814   : > { %v1429_v18 = vmul.f32 %v3893_v17, %v3891_v14 }
 0x816   : > { %v1430_v20 = vpack.c.bf16 %v1429_v18, %v1429_v18 }
 0x818   : > { %3530 = vmatmul.mubr.msk.bf16.vlgmr.msra.gmra.mrb[16].mxu0 %vm910_vm3, %v1430_v20 }
 0x819   : > { %3542 = vmatpush3.bf16.msra.mxu0 %v3814_v19  ;;  %3557 = vmatprep.mubr.msk.bf16.mxu0 %vm3924_vm0, %v3923_v3 }
 0x81a   : > { %3543 = vmatprep.subr.bf16.mxu0 %v3923_v3 }
 0x81d   : > { %3544 = vmatpush3.bf16.msra.mxu0 %v3815_v22 }
 0x81e   : > { %3545 = vmatprep.subr.bf16.mxu0 %v3923_v3 }
 0x821   : > { %3546 = vmatpush3.bf16.msra.mxu0 %v3816_v24 }
 0x822   : > { %3547 = vmatprep.subr.bf16.mxu0 %v3923_v3 }
 0x825   : > { %3548 = vmatpush3.bf16.msra.mxu0 %v3817_v25  ;;  %v3102_v25 = vld [vmem:[%s4694_s8 + $0x2] ss:$0 sm:$0xff] }
 0x826   : > { %3549 = vmatprep.subr.bf16.mxu0 %v3923_v3 }
 0x829   : > { %3550 = vmatpush3.bf16.msra.mxu0 %v3818_v26 }
 0x82a   : > { %3551 = vmatprep.subr.bf16.mxu0 %v3923_v3 }
 0x82d   : > { %3552 = vmatpush3.bf16.msra.mxu0 %v3819_v27 }
 0x82e   : > { %3553 = vmatprep.subr.bf16.mxu0 %v3923_v3 }
 0x831   : > { %3554 = vmatpush3.bf16.msra.mxu0 %v3820_v28 }
 0x832   : > { %3555 = vmatprep.subr.bf16.mxu0 %v3923_v3 }
 0x835   : > { %3556 = vmatpush3.bf16.msra.mxu0 %v3821_v29  ;;  %v3050_v29 = vld [vmem:[%s4690_s4 + $0x2] ss:$0 sm:$0xff] }
 0x836   : > { %3581 = vmatprep.subr.bf16.mxu0 %v3923_v3 }
 0x838   : > { %3558 = vmatmul.mubr.bf16.vlgmr.msra.gmra.mrb[20].mxu0 %v4103_v32 }
 0x839   : > { %3582 = vmatpush3.bf16.msra.mxu0 %v3822_v30  ;;  %3597 = vmatprep.mubr.msk.bf16.mxu0 %vm3924_vm0, %v3923_v3 }
 0x83a   : > { %3583 = vmatprep.subr.bf16.mxu0 %v3923_v3 }
 0x83d   : > { %3584 = vmatpush3.bf16.msra.mxu0 %v3823_v31 }
 0x83e   : > { %3585 = vmatprep.subr.bf16.mxu0 %v3923_v3 }
 0x841   : > { %3586 = vmatpush3.bf16.msra.mxu0 %v3824_v33 }
 0x842   : > { %3587 = vmatprep.subr.bf16.mxu0 %v3923_v3 }
 0x845   : > { %3588 = vmatpush3.bf16.msra.mxu0 %v3825_v34 }
 0x846   : > { %3589 = vmatprep.subr.bf16.mxu0 %v3923_v3 }
 0x849   : > { %3590 = vmatpush3.bf16.msra.mxu0 %v3826_v35 }
 0x84a   : > { %3591 = vmatprep.subr.bf16.mxu0 %v3923_v3 }
 0x84d   : > { %3592 = vmatpush3.bf16.msra.mxu0 %v3827_v36 }
 0x84e   : > { %3593 = vmatprep.subr.bf16.mxu0 %v3923_v3 }
 0x851   : > { %3594 = vmatpush3.bf16.msra.mxu0 %v3828_v37 }
 0x852   : > { %3595 = vmatprep.subr.bf16.mxu0 %v3923_v3 }
 0x855   : > { %3596 = vmatpush3.bf16.msra.mxu0 %v3829_v38 }
 0x856   : > { %3621 = vmatprep.subr.bf16.mxu0 %v3923_v3 }
 0x858   : > { %3598 = vmatmul.mubr.bf16.vlgmr.msra.gmra.mrb[24].mxu0 %v4103_v32 }
 0x859   : > { %3622 = vmatpush3.bf16.msra.mxu0 %v3830_v39  ;;  %3637 = vmatprep.mubr.msk.bf16.mxu0 %vm3924_vm0, %v3923_v3 }
 0x85a   : > { %3623 = vmatprep.subr.bf16.mxu0 %v3923_v3 }
 0x85d   : > { %3624 = vmatpush3.bf16.msra.mxu0 %v3831_v40 }
 0x85e   : > { %3625 = vmatprep.subr.bf16.mxu0 %v3923_v3 }
 0x861   : > { %3626 = vmatpush3.bf16.msra.mxu0 %v3832_v41 }
 0x862   : > { %3627 = vmatprep.subr.bf16.mxu0 %v3923_v3 }
 0x865   : > { %3628 = vmatpush3.bf16.msra.mxu0 %v3833_v42 }
 0x866   : > { %3629 = vmatprep.subr.bf16.mxu0 %v3923_v3 }
 0x869   : > { %3630 = vmatpush3.bf16.msra.mxu0 %v3834_v43 }
 0x86a   : > { %3631 = vmatprep.subr.bf16.mxu0 %v3923_v3 }
 0x86d   : > { %3632 = vmatpush3.bf16.msra.mxu0 %v3835_v44 }
 0x86e   : > { %3633 = vmatprep.subr.bf16.mxu0 %v3923_v3 }
 0x871   : > { %3634 = vmatpush3.bf16.msra.mxu0 %v3836_v45 }
 0x872   : > { %3635 = vmatprep.subr.bf16.mxu0 %v3923_v3 }
 0x875   : > { %3636 = vmatpush3.bf16.msra.mxu0 %v3837_v46 }
 0x876   : > { %3661 = vmatprep.subr.bf16.mxu0 %v3923_v3 }
 0x878   : > { %3638 = vmatmul.mubr.bf16.vlgmr.msra.gmra.mrb[28].mxu0 %v4103_v32 }
 0x879   : > { %3662 = vmatpush3.bf16.msra.mxu0 %v3838_v47  ;;  %3677 = vmatprep.mubr.msk.bf16.mxu0 %vm3924_vm0, %v3923_v3 }
 0x87a   : > { %3663 = vmatprep.subr.bf16.mxu0 %v3923_v3 }
 0x87d   : > { %3664 = vmatpush3.bf16.msra.mxu0 %v3839_v48 }
 0x87e   : > { %3665 = vmatprep.subr.bf16.mxu0 %v3923_v3 }
 0x881   : > { %3666 = vmatpush3.bf16.msra.mxu0 %v3840_v49 }
 0x882   : > { %3667 = vmatprep.subr.bf16.mxu0 %v3923_v3 }
 0x885   : > { %3668 = vmatpush3.bf16.msra.mxu0 %v3841_v50  ;;  %v3856_v50 = vld [vmem:[%s4695_s9 + $0x20] sm:$0xff]  }
 0x886   : > { %3669 = vmatprep.subr.bf16.mxu0 %v3923_v3 }
 0x889   : > { %3670 = vmatpush3.bf16.msra.mxu0 %v3842_v51 }
 0x88a   : > { %3671 = vmatprep.subr.bf16.mxu0 %v3923_v3 }
 0x88d   : > { %3672 = vmatpush3.bf16.msra.mxu0 %v3843_v52  ;;  %v3857_v52 = vld [vmem:[%s4695_s9 + $0x28] sm:$0xff]  }
 0x88e   : > { %3673 = vmatprep.subr.bf16.mxu0 %v3923_v3 }
 0x891   : > { %3674 = vmatpush3.bf16.msra.mxu0 %v3844_v53 }
 0x892   : > { %3675 = vmatprep.subr.bf16.mxu0 %v3923_v3 }
 0x895   : > { %3676 = vmatpush3.bf16.msra.mxu0 %v3845_v54  ;;  %v3858_v54 = vld [vmem:[%s4691_s5 + $0xc0] sm:$0xff]  }
 0x896   : > { %3701 = vmatprep.subr.bf16.mxu0 %v3923_v3 }
 0x898   : > { %3678 = vmatmul.mubr.bf16.vlgmr.msra.gmra.mrb[32].mxu0 %v4103_v32 }
 0x899   : > { %3717 = vmatprep.mubr.msk.bf16.mxu0 %vm3924_vm0, %v3923_v3 }
 0x8eb   : > { %v1472_v55 = vpop.f32.mrb[16].mxu0 }
 0x8ec   : > { %v1483_v57 = vpack.c.bf16 %v1472_v55, %v1472_v55  ;;  %v3531_v58 = vpop.f32.mrb[17].mxu0 }
 0x8ed   : > { %v1475_v59 = vpop.f32.mrb[18].mxu0 }
 0x8ee   : > { %v3532_v60 = vpop.f32.mrb[19].mxu0  ;;  %3538 = vmatmul.mubr.msk.bf16.vlgmr.msra.gmra.mrb[12].mxu1 %vm863_vm1, %v1483_v57  ;;  %v3859_v59 = vld [vmem:[%s4691_s5 + $0xc8] sm:$0xff]  }
 0x8ef   : > { %3562 = vmatpush3.bf16.msra.mxu1 %v3848_v56  ;;  %3577 = vmatprep.mubr.msk.bf16.mxu1 %vm3924_vm0, %v3923_v3  ;;  %v3860_v60 = vld [vmem:[%s4691_s5 + $0xd0] sm:$0xff]  }
 0x8f0   : > { %3563 = vmatprep.subr.bf16.mxu1 %v3923_v3 }
 0x8f3   : > { %3564 = vmatpush3.bf16.msra.mxu1 %v3849_v61  ;;  %v3861_v61 = vld [vmem:[%s4691_s5 + $0xd8] sm:$0xff]  }
 0x8f4   : > { %3565 = vmatprep.subr.bf16.mxu1 %v3923_v3 }
 0x8f7   : > { %3566 = vmatpush3.bf16.msra.mxu1 %v3850_v62  ;;  %v3862_v62 = vld [vmem:[%s4691_s5 + $0xe0] sm:$0xff]  }
 0x8f8   : > { %3567 = vmatprep.subr.bf16.mxu1 %v3923_v3 }
 0x8fb   : > { %3568 = vmatpush3.bf16.msra.mxu1 %v3851_v63  ;;  %v3863_v63 = vld [vmem:[%s4691_s5 + $0xe8] sm:$0xff]  }
 0x8fc   : > { %3569 = vmatprep.subr.bf16.mxu1 %v3923_v3 }
 0x8ff   : > { %3570 = vmatpush3.bf16.msra.mxu1 %v3852_v0  ;;  %v3864_v0 = vld [vmem:[%s4691_s5 + $0xf0] sm:$0xff]  }
 0x900   : > { %3571 = vmatprep.subr.bf16.mxu1 %v3923_v3 }
 0x903   : > { %3572 = vmatpush3.bf16.msra.mxu1 %v3853_v1  ;;  %v3865_v1 = vld [vmem:[%s4691_s5 + $0xf8] sm:$0xff]  }
 0x904   : > { %3573 = vmatprep.subr.bf16.mxu1 %v3923_v3 }
 0x907   : > { %3574 = vmatpush3.bf16.msra.mxu1 %v3854_v2  ;;  %v3163_v2 = vld [vmem:[%s4692_s6 + $0x3] ss:$0 sm:$0xff] }
 0x908   : > { %3575 = vmatprep.subr.bf16.mxu1 %v3923_v3 }
 0x90b   : > { %v1647_v5 = vpop.f32.mrb[20].mxu0  ;;  %3576 = vmatpush3.bf16.msra.mxu1 %v3855_v4 }
 0x90c   : > { %v3559_v6 = vpop.f32.mrb[21].mxu0  ;;  %3601 = vmatprep.subr.bf16.mxu1 %v3923_v3  ;;  %v1648_v33 = vadd.f32 %v3050_v29, %v1647_v5 }
 0x90d   : > { %v1650_v7 = vpop.f32.mrb[22].mxu0 }
 0x90e   : > { %v3560_v8 = vpop.f32.mrb[23].mxu0  ;;  %3578 = vmatmul.mubr.bf16.vlgmr.msra.gmra.mrb[24].mxu1 %v4103_v32  ;;  %v1879_v35 = vpack.c.bf16 %v1648_v33, %v1648_v33  ;;  %v3189_v7 = vld [vmem:[%s4694_s8 + $0x3] ss:$0 sm:$0xff]  ;;  %v3867_v33 = vld [vmem:[%s4695_s9 + $0x38] sm:$0xff]  }
 0x90f   : > { %3603 = vmatprep.mubr.msk.bf16.mxu1 %vm3924_vm0, %v3923_v3 }
 0x92b   : > { %v1873_v9 = vpop.f32.mrb[24].mxu0 }
 0x92c   : > { %v3599_v10 = vpop.f32.mrb[25].mxu0  ;;  %v1874_v30 = vadd.f32 %v3102_v25, %v1873_v9 }
 0x92d   : > { %v1876_v11 = vpop.f32.mrb[26].mxu0 }
 0x92e   : > { %v3600_v12 = vpop.f32.mrb[27].mxu0  ;;  %v1939_v34 = vpack.c.bf16 %v1874_v30, %v1874_v30  ;;  %v3866_v30 = vld [vmem:[%s4695_s9 + $0x30] sm:$0xff]  }
 0x930   : > { %v1944_v36 = vsel %vm927_vm2, %v1939_v34, 0 }
 0x94b   : > { %v4487_v13 = vpop.f32.mrb[28].mxu0 }
 0x94c   : > { %v3639_v14 = vpop.f32.mrb[29].mxu0 }
 0x94d   : > { %v2158_v15 = vpop.f32.mrb[30].mxu0 }
 0x94e   : > { %v3640_v16 = vpop.f32.mrb[31].mxu0 }
 0x96b   : > { %v4489_v17 = vpop.f32.mrb[32].mxu0 }
 0x96c   : > { %v3679_v18 = vpop.f32.mrb[33].mxu0  ;;  %v2382_v11 = vadd.f32 %v3189_v7, %v4489_v17  ;;  %v3877_v7 = vld [vmem:[%s4699_s13 + $0x8] sm:$0xff]  }
 0x96d   : > { %v2384_v19 = vpop.f32.mrb[34].mxu0 }
 0x96e   : > { %v3680_v20 = vpop.f32.mrb[35].mxu0  ;;  %v2447_v15 = vpack.c.bf16 %v2382_v11, %v2382_v11  ;;  %v3882_v11 = vld [vmem:[%s4699_s13 + $0x30] sm:$0xff]  }
 0x970   : > { %v2452_v18 = vsel %vm927_vm2, %v2447_v15, 0 }
 0x9e1   : > { %v1760_v22 = vpop.f32.mrb[24].mxu1 }
 0x9e2   : > { %v1761_v23 = vadd.f32 %v3076_v21, %v1760_v22  ;;  %v3579_v24 = vpop.f32.mrb[25].mxu1 }
 0x9e3   : > { %v1763_v26 = vpop.f32.mrb[26].mxu1 }
 0x9e4   : > { %v1880_v27 = vpack.c.bf16 %v1761_v23, %v1761_v23  ;;  %v3580_v28 = vpop.f32.mrb[27].mxu1 }
 0x9e6   : > { %v1885_v31 = vsel %vm863_vm1, %v1880_v27, 0 }
 0x9e7   : > { %3602 = vmatpush3.bf16.xpose.msra.mxu1 %v1885_v31 }
 0x9e8   : > { %3607 = vmatprep.subr.bf16.mxu1 %v3923_v3 }
 0x9ee   : > { %3604 = vmatmul.mubr.msk.bf16.vlgmr.msra.gmra.mrb[28].mxu1 %vm863_vm1, %v1879_v35 }
 0x9ef   : > { %3608 = vmatpush3.bf16.msra.mxu1 %v1944_v36  ;;  %3609 = vmatprep.mubr.msk.bf16.mxu1 %vm3924_vm0, %v3923_v3 }
 0x9f0   : > { %3613 = vmatprep.subr.bf16.mxu1 %v3923_v3 }
 0xac1   : > { %v1921_v37 = vpop.f32.mrb[28].mxu1 }
 0xac2   : > { %v3605_v38 = vpop.f32.mrb[29].mxu1  ;;  %v1927_v39 = vsel %vm910_vm3, %v1921_v37, -inf }
 0xac3   : > { %1928 = vmax.xlane.f32.xlu0 %v1927_v39  ;;  %v1924_v40 = vpop.f32.mrb[30].mxu1  ;;  %v2913_v39 = vld [vmem:[%s4696_s10] ss:$0 sm:$0xff] }
 0xac4   : > { %v3606_v41 = vpop.f32.mrb[31].mxu1 }
 0xb50   : > { %v1929_v42 = vpop.xlane.xlu0 %1928 }
 0xb51   : > { %v1930_v43 = vsub.f32 %v1921_v37, %v1929_v42 }
 0xb53   : > { %v1931_v44 = vmul.f32 1.442695, %v1930_v43 }
 0xb55   : > { %3894 = vpow2.f32 %v1931_v44 }
 0xb5f   : > { %v3895_v45 = vpop.eup %3894 }
 0xb60   : > { %v1933_v46 = vsel %vm910_vm3, %v3895_v45, 0.0 }
 0xb61   : > { %1934 = vadd.xlane.f32.xlu1 %v1933_v46 }
 0xbee   : > { %v1935_v47 = vpop.xlane.xlu1 %1934 }
 0xbef   : > { %3896 = vrcp.f32 %v1935_v47  ;;  %v3868_v47 = vld [vmem:[%s4697_s11] sm:$0xff]  }
 0xbf0   : > { %3702 = vmatpush3.bf16.msra.mxu0 %v3868_v47  ;;  %v3216_v47 = vld [vmem:[%s4700_s14] ss:$0 sm:$0xff] }
 0xbf1   : > { %3703 = vmatprep.subr.bf16.mxu0 %v3923_v3 }
 0xbf9   : > { %v3897_v48 = vpop.eup %3896 }
 0xbfa   : > { %v1937_v49 = vmul.f32 %v3897_v48, %v3895_v45  ;;  %v4598_v45 = vld [vmem:[%s4021_s23] sm:$0xff]  ;;  %v3869_v48 = vld [vmem:[%s4697_s11 + $0x8] sm:$0xff]  }
 0xbfb   : > { %3704 = vmatpush3.bf16.msra.mxu0 %v3869_v48 }
 0xbfc   : > { %v1938_v51 = vpack.c.bf16 %v1937_v49, %v1937_v49  ;;  %3705 = vmatprep.subr.bf16.mxu0 %v3923_v3 }
 0xbfe   : > { %3610 = vmatmul.mubr.msk.bf16.vlgmr.msra.gmra.mrb[32].mxu1 %vm910_vm3, %v1938_v51 }
 0xbff   : > { %3614 = vmatpush3.bf16.msra.mxu1 %v3856_v50  ;;  %3617 = vmatprep.mubr.msk.bf16.mxu1 %vm3924_vm0, %v3923_v3 }
 0xc00   : > { %3615 = vmatprep.subr.bf16.mxu1 %v3923_v3 }
 0xc03   : > { %3616 = vmatpush3.bf16.msra.mxu1 %v3857_v52 }
 0xc04   : > { %3641 = vmatprep.subr.bf16.mxu1 %v3923_v3 }
 0xcd1   : > { %v1980_v53 = vpop.f32.mrb[32].mxu1 }
 0xcd2   : > { %v1991_v55 = vpack.c.bf16 %v1980_v53, %v1980_v53  ;;  %v3611_v56 = vpop.f32.mrb[33].mxu1  ;;  %v3870_v53 = vld [vmem:[%s4697_s11 + $0x10] sm:$0xff]  }
 0xcd3   : > { %v1983_v57 = vpop.f32.mrb[34].mxu1  ;;  %3706 = vmatpush3.bf16.msra.mxu0 %v3870_v53  ;;  %v3873_v56 = vld [vmem:[%s4697_s11 + $0x28] sm:$0xff]  }
 0xcd4   : > { %v3612_v58 = vpop.f32.mrb[35].mxu1  ;;  %3618 = vmatmul.mubr.msk.bf16.vlgmr.msra.gmra.mrb[12].mxu1 %vm863_vm1, %v1991_v55  ;;  %3707 = vmatprep.subr.bf16.mxu0 %v3923_v3  ;;  %v3872_v55 = vld [vmem:[%s4697_s11 + $0x20] sm:$0xff]   ;;  %v3874_v57 = vld [vmem:[%s4697_s11 + $0x30] sm:$0xff]  }
 0xcd5   : > { %3642 = vmatpush3.bf16.msra.mxu1 %v3858_v54  ;;  %3657 = vmatprep.mubr.msk.bf16.mxu1 %vm3924_vm0, %v3923_v3  ;;  %v3871_v54 = vld [vmem:[%s4697_s11 + $0x18] sm:$0xff]  }
 0xcd6   : > { %3643 = vmatprep.subr.bf16.mxu1 %v3923_v3  ;;  %v3875_v58 = vld [vmem:[%s4697_s11 + $0x38] sm:$0xff]  }
 0xcd7   : > { %3708 = vmatpush3.bf16.msra.mxu0 %v3871_v54 }
 0xcd8   : > { %3709 = vmatprep.subr.bf16.mxu0 %v3923_v3 }
 0xcd9   : > { %3644 = vmatpush3.bf16.msra.mxu1 %v3859_v59 }
 0xcda   : > { %3645 = vmatprep.subr.bf16.mxu1 %v3923_v3 }
 0xcdb   : > { %3710 = vmatpush3.bf16.msra.mxu0 %v3872_v55 }
 0xcdc   : > { %3711 = vmatprep.subr.bf16.mxu0 %v3923_v3 }
 0xcdd   : > { %3646 = vmatpush3.bf16.msra.mxu1 %v3860_v60 }
 0xcde   : > { %3647 = vmatprep.subr.bf16.mxu1 %v3923_v3 }
 0xcdf   : > { %3712 = vmatpush3.bf16.msra.mxu0 %v3873_v56 }
 0xce0   : > { %3713 = vmatprep.subr.bf16.mxu0 %v3923_v3 }
 0xce1   : > { %3648 = vmatpush3.bf16.msra.mxu1 %v3861_v61 }
 0xce2   : > { %3649 = vmatprep.subr.bf16.mxu1 %v3923_v3 }
 0xce3   : > { %3714 = vmatpush3.bf16.msra.mxu0 %v3874_v57 }
 0xce4   : > { %3715 = vmatprep.subr.bf16.mxu0 %v3923_v3 }
 0xce5   : > { %3650 = vmatpush3.bf16.msra.mxu1 %v3862_v62 }
 0xce6   : > { %3651 = vmatprep.subr.bf16.mxu1 %v3923_v3 }
 0xce7   : > { %3716 = vmatpush3.bf16.msra.mxu0 %v3875_v58 }
 0xce9   : > { %3652 = vmatpush3.bf16.msra.mxu1 %v3863_v63 }
 0xcea   : > { %3653 = vmatprep.subr.bf16.mxu1 %v3923_v3 }
 0xced   : > { %3654 = vmatpush3.bf16.msra.mxu1 %v3864_v0  ;;  %v3913_v0 = vld [vmem:[%s4687_s1] ss:$0 sm:$0xff] }
 0xcee   : > { %3655 = vmatprep.subr.bf16.mxu1 %v3923_v3 }
 0xcf1   : > { %3656 = vmatpush3.bf16.msra.mxu1 %v3865_v1 }
 0xcf2   : > { %3681 = vmatprep.subr.bf16.mxu1 %v3923_v3 }
 0xcf4   : > { %3658 = vmatmul.mubr.bf16.vlgmr.msra.gmra.mrb[36].mxu1 %v4103_v32  ;;  %v3137_v32 = vld [vmem:[%s4690_s4 + $0x3] ss:$0 sm:$0xff] }
 0xcf5   : > { %3683 = vmatprep.mubr.msk.bf16.mxu1 %vm3924_vm0, %v3923_v3  ;;  %v2156_v14 = vadd.f32 %v3137_v32, %v4487_v13  ;;  %v3881_v32 = vld [vmem:[%s4699_s13 + $0x28] sm:$0xff]  }
 0xcf7   : > { %v2387_v16 = vpack.c.bf16 %v2156_v14, %v2156_v14  ;;  %v3207_v14 = vld [vmem:[%s4698_s12] ss:$0 sm:$0xff] }
 0xdc7   : > { %v2268_v4 = vpop.f32.mrb[36].mxu1 }
 0xdc8   : > { %v2269_v5 = vadd.f32 %v3163_v2, %v2268_v4  ;;  %v3659_v6 = vpop.f32.mrb[37].mxu1  ;;  %v3914_v2 = vld [vmem:[%s4688_s2] ss:$0 sm:$0xff] }
 0xdc9   : > { %v2271_v8 = vpop.f32.mrb[38].mxu1  ;;  %v3876_v6 = vld [vmem:[%s4699_s13] sm:$0xff]  }
 0xdca   : > { %v2388_v9 = vpack.c.bf16 %v2269_v5, %v2269_v5  ;;  %v3660_v10 = vpop.f32.mrb[39].mxu1  ;;  %v3878_v8 = vld [vmem:[%s4699_s13 + $0x10] sm:$0xff]  }
 0xdcb   : > { %v3880_v10 = vld [vmem:[%s4699_s13 + $0x20] sm:$0xff]  }
 0xdcc   : > { %v2393_v12 = vsel %vm863_vm1, %v2388_v9, 0  ;;  %v3879_v9 = vld [vmem:[%s4699_s13 + $0x18] sm:$0xff]  }
 0xdcd   : > { %3682 = vmatpush3.bf16.xpose.msra.mxu1 %v2393_v12  ;;  %v3883_v12 = vld [vmem:[%s4699_s13 + $0x38] sm:$0xff]  }
 0xdce   : > { %3687 = vmatprep.subr.bf16.mxu1 %v3923_v3 }
 0xdd4   : > { %3684 = vmatmul.mubr.msk.bf16.vlgmr.msra.gmra.mrb[40].mxu1 %vm863_vm1, %v2387_v16 }
 0xdd5   : > { %3688 = vmatpush3.bf16.msra.mxu1 %v2452_v18  ;;  %3689 = vmatprep.mubr.msk.bf16.mxu1 %vm3924_vm0, %v3923_v3 }
 0xdd6   : > { %3693 = vmatprep.subr.bf16.mxu1 %v3923_v3 }
 0xea7   : > { %v2429_v17 = vpop.f32.mrb[40].mxu1 }
 0xea8   : > { %v3685_v19 = vpop.f32.mrb[41].mxu1  ;;  %v2435_v20 = vsel %vm910_vm3, %v2429_v17, -inf }
 0xea9   : > { %2436 = vmax.xlane.f32.xlu0 %v2435_v20  ;;  %v2432_v13 = vpop.f32.mrb[42].mxu1 }
 0xeaa   : > { %v3686_v21 = vpop.f32.mrb[43].mxu1 }
 0xf36   : > { %v2437_v22 = vpop.xlane.xlu0 %2436 }
 0xf37   : > { %v2438_v23 = vsub.f32 %v2429_v17, %v2437_v22 }
 0xf39   : > { %v2439_v24 = vmul.f32 1.442695, %v2438_v23 }
 0xf3b   : > { %3898 = vpow2.f32 %v2439_v24 }
 0xf45   : > { %v3899_v25 = vpop.eup %3898 }
 0xf46   : > { %v2441_v26 = vsel %vm910_vm3, %v3899_v25, 0.0 }
 0xf47   : > { %2442 = vadd.xlane.f32.xlu1 %v2441_v26 }
 0xfd4   : > { %v2443_v27 = vpop.xlane.xlu1 %2442 }
 0xfd5   : > { %3900 = vrcp.f32 %v2443_v27 }
 0xfdf   : > { %v3901_v28 = vpop.eup %3900 }
 0xfe0   : > { %v2445_v29 = vmul.f32 %v3901_v28, %v3899_v25 }
 0xfe2   : > { %v2446_v31 = vpack.c.bf16 %v2445_v29, %v2445_v29 }
 0xfe4   : > { %3690 = vmatmul.mubr.msk.bf16.vlgmr.msra.gmra.mrb[44].mxu1 %vm910_vm3, %v2446_v31 }
 0xfe5   : > { %3694 = vmatpush3.bf16.msra.mxu1 %v3866_v30  ;;  %3697 = vmatprep.mubr.msk.bf16.mxu1 %vm3924_vm0, %v3923_v3 }
 0xfe6   : > { %3695 = vmatprep.subr.bf16.mxu1 %v3923_v3 }
 0xfe9   : > { %3696 = vmatpush3.bf16.msra.mxu1 %v3867_v33 }
 0xfea   : > { %3721 = vmatprep.subr.bf16.mxu1 %v3923_v3 }
0x10b7   : > { %v2488_v34 = vpop.f32.mrb[44].mxu1 }
0x10b8   : > { %v2499_v35 = vpack.c.bf16 %v2488_v34, %v2488_v34  ;;  %v3691_v36 = vpop.f32.mrb[45].mxu1 }
0x10b9   : > { %v2491_v37 = vpop.f32.mrb[46].mxu1 }
0x10ba   : > { %v3692_v38 = vpop.f32.mrb[47].mxu1  ;;  %3698 = vmatmul.mubr.msk.bf16.vlgmr.msra.gmra.mrb[12].mxu1 %vm863_vm1, %v2499_v35 }
0x10bb   : > { %3737 = vmatprep.mubr.msk.bf16.mxu1 %vm3924_vm0, %v3923_v3  ;;  %3722 = vmatpush3.bf16.msra.mxu1 %v3876_v6 }
0x10bc   : > { %3723 = vmatprep.subr.bf16.mxu1 %v3923_v3 }
0x10bf   : > { %3724 = vmatpush3.bf16.msra.mxu1 %v3877_v7 }
0x10c0   : > { %3725 = vmatprep.subr.bf16.mxu1 %v3923_v3 }
0x10c3   : > { %3726 = vmatpush3.bf16.msra.mxu1 %v3878_v8 }
0x10c4   : > { %3727 = vmatprep.subr.bf16.mxu1 %v3923_v3 }
0x10c7   : > { %3728 = vmatpush3.bf16.msra.mxu1 %v3879_v9 }
0x10c8   : > { %3729 = vmatprep.subr.bf16.mxu1 %v3923_v3 }
0x10cb   : > { %3730 = vmatpush3.bf16.msra.mxu1 %v3880_v10 }
0x10cc   : > { %3731 = vmatprep.subr.bf16.mxu1 %v3923_v3 }
0x10cf   : > { %3732 = vmatpush3.bf16.msra.mxu1 %v3881_v32 }
0x10d0   : > { %3733 = vmatprep.subr.bf16.mxu1 %v3923_v3 }
0x10d3   : > { %3734 = vmatpush3.bf16.msra.mxu1 %v3882_v11 }
0x10d4   : > { %3735 = vmatprep.subr.bf16.mxu1 %v3923_v3 }
0x10d7   : > { %3736 = vmatpush3.bf16.msra.mxu1 %v3883_v12 }
0x118d   : > { %v2549_v40 = vpop.f32.mrb[12].mxu1 }
0x118e   : > { %v4595_v41 = vadd.f32 %v2913_v39, %v2549_v40  ;;  %v3699_v42 = vpop.f32.mrb[13].mxu1 }
0x118f   : > { %v2552_v43 = vpop.f32.mrb[14].mxu1 }
0x1190   : > { %v3700_v44 = vpop.f32.mrb[15].mxu1  ;;  %v2556_v46 = vadd.f32 %v4598_v45, %v4595_v41 }
0x1192   : > { %2557 = vadd.xlane.f32.xlu0 %v2556_v46 }
0x121f   : > { %v2558_v49 = vpop.xlane.xlu0 %2557 }
0x1220   : > { %v2559_v50 = vmul.f32 0.0078125, %v2558_v49 }
0x1222   : > { %v2560_v51 = vsub.f32 %v2556_v46, %v2559_v50 }
0x1224   : > { %v2561_v52 = vmul.f32 %v2560_v51, %v2560_v51 }
0x1226   : > { %2562 = vadd.xlane.f32.xlu1 %v2561_v52 }
0x12b3   : > { %v2563_v59 = vpop.xlane.xlu1 %2562 }
0x12b4   : > { %v2564_v60 = vmul.f32 0.0078125, %v2563_v59 }
0x12b6   : > { %v2565_v61 = vadd.f32 1e-05, %v2564_v60 }
0x12b8   : > { %3902 = vrsqrt.f32 %v2565_v61 }
0x12c2   : > { %v3903_v62 = vpop.eup %3902 }
0x12c3   : > { %v2567_v63 = vmul.f32 %v3903_v62, %v2560_v51 }
0x12c5   : > { %v2568_v1 = vmul.f32 %v3913_v0, %v2567_v63 }
0x12c7   : > { %v2569_v4 = vadd.f32 %v3914_v2, %v2568_v1 }
0x12c9   : > { %v2586_v5 = vpack.c.bf16 %v2569_v4, %v2569_v4 }
0x12cb   : > { %3718 = vmatmul.mubr.bf16.vlgmr.msra.gmra.mrb[36].mxu0 %v2586_v5 }
0x139e   : > { %v2676_v15 = vpop.f32.mrb[36].mxu0 }
0x139f   : > { %v2677_v16 = vadd.f32 %v3207_v14, %v2676_v15  ;;  %v3719_v18 = vpop.f32.mrb[37].mxu0 }
0x13a0   : > { %v2679_v17 = vpop.f32.mrb[38].mxu0 }
0x13a1   : > { %v2683_v19 = vmul.f32 0.70710677, %v2677_v16  ;;  %v3720_v20 = vpop.f32.mrb[39].mxu0  ;;  %v2682_v42 = vmul.f32 0.5, %v2677_v16 }
0x13a3   : > { %v2684_v13 = vand.u32 2147483647, %v2683_v19  ;;  %vm2704_vm4 = vcmp.ge.f32.partialorder %v2683_v19, 0.0 }
0x13a5   : > { %v2685_v21 = vmul.f32 0.3275911, %v2684_v13  ;;  %v2698_v3 = vsub.f32 0.0, %v2684_v13 }
0x13a7   : > { %v2686_v22 = vadd.f32 1.0, %v2685_v21  ;;  %v2699_v24 = vmul.f32 %v2698_v3, %v2684_v13 }
0x13a9   : > { %3904 = vrcp.f32 %v2686_v22  ;;  %v2700_v27 = vmul.f32 1.442695, %v2699_v24 }
0x13ab   : > { %3906 = vpow2.f32 %v2700_v27 }
0x13b3   : > { %v3905_v23 = vpop.eup %3904 }
0x13b4   : > { %v2689_v25 = vmul.f32 1.0614054, %v3905_v23 }
0x13b5   : > { %v3907_v36 = vpop.eup %3906 }
0x13b6   : > { %v2690_v26 = vadd.f32 -1.4531521, %v2689_v25 }
0x13b8   : > { %v2691_v28 = vmul.f32 %v3905_v23, %v2690_v26 }
0x13ba   : > { %v2692_v29 = vadd.f32 1.4214138, %v2691_v28 }
0x13bc   : > { %v2693_v30 = vmul.f32 %v3905_v23, %v2692_v29 }
0x13be   : > { %v2694_v31 = vadd.f32 -0.28449672, %v2693_v30 }
0x13c0   : > { %v2695_v33 = vmul.f32 %v3905_v23, %v2694_v31 }
0x13c2   : > { %v2696_v34 = vadd.f32 0.2548296, %v2695_v33 }
0x13c4   : > { %v2697_v35 = vmul.f32 %v3905_v23, %v2696_v34 }
0x13c6   : > { %v2702_v37 = vmul.f32 %v3907_v36, %v2697_v35 }
0x13c8   : > { %v2703_v38 = vsub.f32 1.0, %v2702_v37 }
0x13ca   : > { %v2705_v39 = vsub.f32 0.0, %v2703_v38 }
0x13cc   : > { %v2706_v40 = vsel %vm2704_vm4, %v2703_v38, %v2705_v39 }
0x13cd   : > { %v2707_v43 = vadd.f32 1.0, %v2706_v40 }
0x13cf   : > { %v2708_v44 = vmul.f32 %v2707_v43, %v2682_v42 }
0x13d1   : > { %v2725_v46 = vpack.c.bf16 %v2708_v44, %v2708_v44 }
0x13d3   : > { %3738 = vmatmul.mubr.bf16.vlgmr.msra.gmra.mrb[48].mxu1 %v2725_v46 }
0x14a6   : > { %v2815_v48 = vpop.f32.mrb[48].mxu1 }
0x14a7   : > { %v2816_v49 = vadd.f32 %v3216_v47, %v2815_v48  ;;  %v3739_v50 = vpop.f32.mrb[49].mxu1 }
0x14a8   : > { %v2818_v51 = vpop.f32.mrb[50].mxu1 }
0x14a9   : > { %v2822_v52 = vmul.f32 0.70710677, %v2816_v49  ;;  %v3740_v53 = vpop.f32.mrb[51].mxu1  ;;  %v2821_v11 = vmul.f32 0.5, %v2816_v49 }
0x14ab   : > { %v2823_v54 = vand.u32 2147483647, %v2822_v52  ;;  %vm2843_vm5 = vcmp.ge.f32.partialorder %v2822_v52, 0.0 }
0x14ad   : > { %v2824_v55 = vmul.f32 0.3275911, %v2823_v54  ;;  %v2837_v57 = vsub.f32 0.0, %v2823_v54 }
0x14af   : > { %v2825_v56 = vadd.f32 1.0, %v2824_v55  ;;  %v2838_v59 = vmul.f32 %v2837_v57, %v2823_v54 }
0x14b1   : > { %3908 = vrcp.f32 %v2825_v56  ;;  %v2839_v62 = vmul.f32 1.442695, %v2838_v59 }
0x14b3   : > { %3910 = vpow2.f32 %v2839_v62 }
0x14bb   : > { %v3909_v58 = vpop.eup %3908 }
0x14bc   : > { %v2828_v60 = vmul.f32 1.0614054, %v3909_v58 }
0x14bd   : > { %v3911_v7 = vpop.eup %3910 }
0x14be   : > { %v2829_v61 = vadd.f32 -1.4531521, %v2828_v60 }
0x14c0   : > { %v2830_v63 = vmul.f32 %v3909_v58, %v2829_v61 }
0x14c2   : > { %v2831_v0 = vadd.f32 1.4214138, %v2830_v63 }
0x14c4   : > { %v2832_v1 = vmul.f32 %v3909_v58, %v2831_v0 }
0x14c6   : > { %v2833_v2 = vadd.f32 -0.28449672, %v2832_v1 }
0x14c8   : > { %v2834_v4 = vmul.f32 %v3909_v58, %v2833_v2 }
0x14ca   : > { %v2835_v5 = vadd.f32 0.2548296, %v2834_v4 }
0x14cc   : > { %v2836_v6 = vmul.f32 %v3909_v58, %v2835_v5 }
0x14ce   : > { %v2841_v8 = vmul.f32 %v3911_v7, %v2836_v6 }
0x14d0   : > { %v2842_v9 = vsub.f32 1.0, %v2841_v8 }
0x14d2   : > { %v2844_v10 = vsub.f32 0.0, %v2842_v9 }
0x14d4   : > { %v2845_v32 = vsel %vm2843_vm5, %v2842_v9, %v2844_v10 }
0x14d5   : > { %v2846_v12 = vadd.f32 1.0, %v2845_v32 }
0x14d7   : > { %v2847_v14 = vmul.f32 %v2846_v12, %v2821_v11 }
0x14d9   : > { %v2848_v15 = vadd.f32 %v4595_v41, %v2847_v14 }
0x14db   : > { %v2849_v16 = vadd.f32 %v4598_v45, %v2848_v15 }
0x14dd   : > { %2850 = vst [vmem:[%s489_s25] sm:$0xff] %v2849_v16 }
0x14de PF: > { %s25_s18 = sadd.s32 1, %s3921_s18  }
0x14df   : > { %p22_p4 = scmp.ge.s32.totalorder %s25_s18, 4  }
0x14e1   :  { %24 = sbr.rel (!%p22_p4) target bundleno = 1 (0x1), region = 131 }

</bundles_post_ra>
